<compile_context>
chip_gen: v6e
topology: v6e:2x2x1
jax: 0.10.0
libtpu: 0.0.40
codegen_flags: <defaults>
</compile_context>

<pallas_src>
import functools

import jax
import jax.numpy as jnp
from jax.experimental import pallas as pl
from jax.experimental.pallas import tpu as pltpu


def _round_up(x, m):
    return (x + m - 1) // m * m


def _pick_tile(dim, cap, align):
    """Pick (tile, padded_dim).

    dim <= cap : single full-extent block (always legal, zero padding).
    dim >  cap : the multiple-of-`align` tile <= cap minimizing padded waste
                 (avoids e.g. M=394 -> Mp=512 with tm=256).
    """
    if dim <= cap:
        return dim, dim
    best_t, best_p = None, None
    t = (cap // align) * align
    while t >= align:
        p = _round_up(dim, t)
        if best_p is None or p < best_p:
            best_t, best_p = t, p
        t -= align
    return best_t, best_p


# --------------------------------------------------------------------------
# Exact GELU: erf via Abramowitz & Stegun 7.1.26 polynomial (|err| < 1.5e-7),
# built from ops guaranteed to lower in Mosaic (abs / exp / where / FMA).
# --------------------------------------------------------------------------
def _erf(x):
    a1, a2, a3, a4, a5 = (0.254829592, -0.284496736, 1.421413741,
                          -1.453152027, 1.061405429)
    p = 0.3275911
    ax = jnp.abs(x)
    t = 1.0 / (1.0 + p * ax)
    poly = ((((a5 * t + a4) * t + a3) * t + a2) * t + a1) * t
    y = 1.0 - poly * jnp.exp(-ax * ax)
    return jnp.where(x < 0.0, -y, y)


def _gelu_exact(x):
    return 0.5 * x * (1.0 + _erf(x * 0.7071067811865476))


# --------------------------------------------------------------------------
# Tiled matmul + bias (+ optional GELU / residual) — qkv / proj / fc1 / fc2
# --------------------------------------------------------------------------
def _make_matmul_kernel(activation, has_residual):
    def kernel(*refs):
        if has_residual:
            x_ref, w_ref, b_ref, r_ref, o_ref, acc_ref = refs
        else:
            x_ref, w_ref, b_ref, o_ref, acc_ref = refs
            r_ref = None
        k = pl.program_id(2)

        @pl.when(k == 0)
        def _():
            acc_ref[...] = jnp.zeros_like(acc_ref)

        acc_ref[...] += jnp.dot(
            x_ref[...], w_ref[...], preferred_element_type=jnp.float32
        )

        @pl.when(k == pl.num_programs(2) - 1)
        def _():
            y = acc_ref[...] + b_ref[...]
            if activation == "gelu":
                y = _gelu_exact(y)
            if has_residual:
                y = y + r_ref[...].astype(jnp.float32)
            o_ref[...] = y.astype(o_ref.dtype)

    return kernel


def linear_fused(x2d, w, b, *, residual=None, activation=None,
                 out_dtype=jnp.float32, bm=512, bn=512, bk=1024):
    """x2d: (M, K); w: (K, N) in (in, out) layout (pre-cast bf16); b: (N,).

    Fuses bias, optional exact GELU and optional f32 residual add into the
    last-k epilogue.  Returns (M, N) in `out_dtype`.
    """
    M, K = x2d.shape
    K2, N = w.shape
    assert K2 == K

    if x2d.dtype != jnp.bfloat16:
        x2d = x2d.astype(jnp.bfloat16)
    if w.dtype != jnp.bfloat16:
        w = w.astype(jnp.bfloat16)
    b = b.astype(jnp.float32)

    tm, Mp = _pick_tile(M, bm, 8)
    tn, Np = _pick_tile(N, bn, 128)
    tk, Kp = _pick_tile(K, bk, 128)

    if (Mp, Kp) != (M, K):
        x2d = jnp.pad(x2d, ((0, Mp - M), (0, Kp - K)))
    if (Kp, Np) != (K, N):
        w = jnp.pad(w, ((0, Kp - K), (0, Np - N)))
    if Np != N:
        b = jnp.pad(b, (0, Np - N))
    b = b.reshape(1, Np)

    has_res = residual is not None
    ins = [x2d, w, b]
    in_specs = [
        pl.BlockSpec((tm, tk), lambda i, j, k: (i, k)),
        pl.BlockSpec((tk, tn), lambda i, j, k: (k, j)),
        pl.BlockSpec((1, tn), lambda i, j, k: (0, j)),   # bias: N-tile only
    ]
    if has_res:
        r = residual.astype(jnp.float32)
        if (Mp, Np) != (M, N):
            r = jnp.pad(r, ((0, Mp - M), (0, Np - N)))
        ins.append(r)
        in_specs.append(pl.BlockSpec((tm, tn), lambda i, j, k: (i, j)))

    cost = pl.CostEstimate(
        flops=2 * Mp * Np * Kp,
        transcendentals=(Mp * Np if activation == "gelu" else 0),
        bytes_accessed=int(
            Mp * Kp * 2 + Kp * Np * 2
            + Mp * Np * jnp.dtype(out_dtype).itemsize
            + (Mp * Np * 4 if has_res else 0)
        ),
    )

    out = pl.pallas_call(
        _make_matmul_kernel(activation, has_res),
        out_shape=jax.ShapeDtypeStruct((Mp, Np), out_dtype),
        grid=(Mp // tm, Np // tn, Kp // tk),
        in_specs=in_specs,
        out_specs=pl.BlockSpec((tm, tn), lambda i, j, k: (i, j)),
        scratch_shapes=[pltpu.VMEM((tm, tn), jnp.float32)],
        compiler_params=pltpu.CompilerParams(
            dimension_semantics=("parallel", "parallel", "arbitrary"),
            vmem_limit_bytes=64 * 1024 * 1024,
        ),
        cost_estimate=cost,
    )(*ins)
    if (Mp, Np) != (M, N):
        out = out[:M, :N]
    return out


# --------------------------------------------------------------------------
# LayerNorm kernels (single, and fused double-apply for norm1(norm1(x)))
# --------------------------------------------------------------------------
def _ln_math(x, g, b, eps):
    mu = jnp.mean(x, axis=-1, keepdims=True)
    xc = x - mu
    var = jnp.mean(xc * xc, axis=-1, keepdims=True)
    return xc * jax.lax.rsqrt(var + eps) * g + b


def _double_ln_kernel(x_ref, g_ref, b_ref, x1_ref, y_ref, *, eps):
    x = x_ref[...].astype(jnp.float32)
    g = g_ref[...]
    b = b_ref[...]
    x1 = _ln_math(x, g, b, eps)          # x1 = norm1(x_in)   (residual base)
    y = _ln_math(x1, g, b, eps)          # y  = norm1(x1)     (attention input)
    x1_ref[...] = x1.astype(x1_ref.dtype)
    y_ref[...] = y.astype(y_ref.dtype)


def _single_ln_kernel(x_ref, g_ref, b_ref, o_ref, *, eps):
    x = x_ref[...].astype(jnp.float32)
    o_ref[...] = _ln_math(x, g_ref[...], b_ref[...], eps).astype(o_ref.dtype)


def double_layernorm(x2d, gamma, beta, *, eps=1e-5, block_rows=256):
    """Returns (x1 f32, y bf16) = (LN(x), LN(LN(x))) reading x exactly once."""
    M, C = x2d.shape
    tm, Mp = _pick_tile(M, block_rows, 8)
    xp = x2d if Mp == M else jnp.pad(x2d, ((0, Mp - M), (0, 0)))
    g = gamma.astype(jnp.float32).reshape(1, C)
    b = beta.astype(jnp.float32).reshape(1, C)

    x1, y = pl.pallas_call(
        functools.partial(_double_ln_kernel, eps=eps),
        out_shape=(jax.ShapeDtypeStruct((Mp, C), jnp.float32),
                   jax.ShapeDtypeStruct((Mp, C), jnp.bfloat16)),
        grid=(Mp // tm,),
        in_specs=[
            pl.BlockSpec((tm, C), lambda i: (i, 0)),
            pl.BlockSpec((1, C), lambda i: (0, 0)),
            pl.BlockSpec((1, C), lambda i: (0, 0)),
        ],
        out_specs=(pl.BlockSpec((tm, C), lambda i: (i, 0)),
                   pl.BlockSpec((tm, C), lambda i: (i, 0))),
        compiler_params=pltpu.CompilerParams(dimension_semantics=("parallel",)),
    )(xp, g, b)
    if Mp != M:
        x1, y = x1[:M], y[:M]
    return x1, y


def layernorm(x2d, gamma, beta, *, eps=1e-5, block_rows=256,
              out_dtype=jnp.bfloat16):
    M, C = x2d.shape
    tm, Mp = _pick_tile(M, block_rows, 8)
    xp = x2d if Mp == M else jnp.pad(x2d, ((0, Mp - M), (0, 0)))
    g = gamma.astype(jnp.float32).reshape(1, C)
    b = beta.astype(jnp.float32).reshape(1, C)

    out = pl.pallas_call(
        functools.partial(_single_ln_kernel, eps=eps),
        out_shape=jax.ShapeDtypeStruct((Mp, C), out_dtype),
        grid=(Mp // tm,),
        in_specs=[
            pl.BlockSpec((tm, C), lambda i: (i, 0)),
            pl.BlockSpec((1, C), lambda i: (0, 0)),
            pl.BlockSpec((1, C), lambda i: (0, 0)),
        ],
        out_specs=pl.BlockSpec((tm, C), lambda i: (i, 0)),
        compiler_params=pltpu.CompilerParams(dimension_semantics=("parallel",)),
    )(xp, g, b)
    return out[:M] if Mp != M else out


# --------------------------------------------------------------------------
# Attention core: per batch element, all heads looped inside the kernel.
# Reads the (N, 3C) qkv slab directly (q|k|v interleaved by head within the
# last dim), writes a lane-dense (N, C) output slab.  bf16 MXU, f32 softmax.
# --------------------------------------------------------------------------
def _attention_kernel(qkv_ref, o_ref, *, num_heads, head_dim, dim, scale):
    qkv = qkv_ref[...]                                   # (N, 3C) bf16
    for h in range(num_heads):
        q = qkv[:, h * head_dim:(h + 1) * head_dim]
        k = qkv[:, dim + h * head_dim:dim + (h + 1) * head_dim]
        v = qkv[:, 2 * dim + h * head_dim:2 * dim + (h + 1) * head_dim]
        # q @ k^T without materializing a transpose (contract last dims).
        s = jax.lax.dot_general(
            q, k, (((1,), (1,)), ((), ())), preferred_element_type=jnp.float32
        ) * scale
        m = jnp.max(s, axis=-1, keepdims=True)
        p = jnp.exp(s - m)
        denom = jnp.sum(p, axis=-1, keepdims=True)
        p = p * pl.reciprocal(denom, approx=True)        # divide on the EUP
        o_h = jnp.dot(p.astype(v.dtype), v, preferred_element_type=jnp.float32)
        o_ref[:, h * head_dim:(h + 1) * head_dim] = o_h.astype(o_ref.dtype)


def attention(qkv, *, num_heads, head_dim, dim, scale):
    """qkv: (B, N, 3C) bf16 -> (B, N, C) bf16."""
    B, N, threeC = qkv.shape
    kernel = functools.partial(_attention_kernel, num_heads=num_heads,
                               head_dim=head_dim, dim=dim, scale=scale)
    return pl.pallas_call(
        kernel,
        out_shape=jax.ShapeDtypeStruct((B, N, dim), jnp.bfloat16),
        grid=(B,),
        in_specs=[pl.BlockSpec((pl.Squeezed(), N, threeC),
                               lambda b: (b, 0, 0))],
        out_specs=pl.BlockSpec((pl.Squeezed(), N, dim), lambda b: (b, 0, 0)),
        compiler_params=pltpu.CompilerParams(dimension_semantics=("parallel",)),
    )(qkv)


# --------------------------------------------------------------------------
# Block forward (Pallas path)
# --------------------------------------------------------------------------
def prepare_params(params):
    """Pre-cast once outside the forward: weights -> bf16, everything else f32."""
    out = {}
    for k, v in params.items():
        out[k] = v.astype(jnp.bfloat16 if k.startswith("w_") else jnp.float32)
    return out


def block_forward(x, params, num_heads, eps=1e-5):
    B, N, C = x.shape
    H = num_heads
    assert C % H == 0
    hd = C // H
    scale = hd ** -0.5
    M = B * N

    x2d = x.reshape(M, C)
    # Fused norm1 applied twice: x1 (f32 residual base), y (bf16 attn input).
    x1, y = double_layernorm(x2d, params["g1"], params["b1"], eps=eps)

    # Attention branch (no XLA transposes: heads sliced inside the kernel).
    qkv = linear_fused(y, params["w_qkv"], params["b_qkv"],
                       out_dtype=jnp.bfloat16)            # (M, 3C)
    qkv = qkv.reshape(B, N, 3 * C)
    attn_out = attention(qkv, num_heads=H, head_dim=hd, dim=C, scale=scale)
    attn_out = attn_out.reshape(M, C)                     # (M, C) bf16
    # proj with the residual add fused into the epilogue: x2 = x1 + proj(attn)
    x2 = linear_fused(attn_out, params["w_proj"], params["b_proj"],
                      residual=x1, out_dtype=jnp.float32)

    # MLP branch: GELU fused into fc1 epilogue, residual fused into fc2.
    z = layernorm(x2, params["g2"], params["b2"], eps=eps)       # bf16
    h = linear_fused(z, params["w_fc1"], params["b_fc1"],
                     activation="gelu", out_dtype=jnp.bfloat16)
    out = linear_fused(h, params["w_fc2"], params["b_fc2"],
                       residual=x2, out_dtype=jnp.float32)
    return out.reshape(B, N, C)


# --------------------------------------------------------------------------
# Pure-JAX reference with the identical numerics policy (bf16 MXU inputs,
# f32 accumulation / softmax / LayerNorm, bf16 inter-linear activations).
# --------------------------------------------------------------------------
def block_reference(x, p, num_heads, eps=1e-5):
    B, N, C = x.shape
    H = num_heads
    hd = C // H
    scale = hd ** -0.5
    f32, bf16 = jnp.float32, jnp.bfloat16

    def ln(t, g, b):
        t = t.astype(f32)
        mu = jnp.mean(t, -1, keepdims=True)
        var = jnp.mean(jnp.square(t - mu), -1, keepdims=True)
        return (t - mu) * jax.lax.rsqrt(var + eps) * g.astype(f32) + b.astype(f32)

    def lin(t, w, b):
        return jnp.dot(t.astype(bf16), w.astype(bf16),
                       preferred_element_type=f32) + b.astype(f32)

    x2d = x.reshape(B * N, C)
    x1 = ln(x2d, p["g1"], p["b1"])
    y = ln(x1, p["g1"], p["b1"]).astype(bf16)

    qkv = lin(y, p["w_qkv"], p["b_qkv"]).astype(bf16)
    qkv = qkv.reshape(B, N, 3, H, hd).transpose(2, 0, 3, 1, 4)     # (3,B,H,N,hd)
    q, k, v = qkv[0], qkv[1], qkv[2]
    s = jnp.einsum("bhqd,bhkd->bhqk", q, k,
                   preferred_element_type=f32) * scale
    s = s - jnp.max(s, -1, keepdims=True)
    pm = jnp.exp(s)
    pm = pm / jnp.sum(pm, -1, keepdims=True)
    o = jnp.einsum("bhqk,bhkd->bhqd", pm.astype(bf16), v,
                   preferred_element_type=f32)
    o = o.transpose(0, 2, 1, 3).reshape(B * N, C).astype(bf16)
    x2 = x1 + lin(o, p["w_proj"], p["b_proj"])

    z = ln(x2, p["g2"], p["b2"]).astype(bf16)
    h = jax.nn.gelu(lin(z, p["w_fc1"], p["b_fc1"]), approximate=False).astype(bf16)
    out = x2 + lin(h, p["w_fc2"], p["b_fc2"])
    return out.reshape(B, N, C)


if __name__ == "__main__":
    # Small shapes consistent with the module: batch=2, seq=8, dim=32,
    # num_heads=4 (head_dim=8), mlp_ratio=4 -> hidden=128.
    B, N, C = 2, 8, 32
    H = 4
    hidden = int(C * 4.0)

    key = jax.random.PRNGKey(0)
    ks = jax.random.split(key, 12)
    x = jax.random.normal(ks[0], (B, N, C), dtype=jnp.float32)

    params = dict(
        g1=1.0 + 0.05 * jax.random.normal(ks[1], (C,), jnp.float32),
        b1=0.05 * jax.random.normal(ks[2], (C,), jnp.float32),
        g2=1.0 + 0.05 * jax.random.normal(ks[3], (C,), jnp.float32),
        b2=0.05 * jax.random.normal(ks[4], (C,), jnp.float32),
        # Linear weights stored as (in_features, out_features): transposed
        # once outside the forward path (no per-call .T / cast).
        w_qkv=0.1 * jax.random.normal(ks[5], (C, 3 * C), jnp.float32),
        b_qkv=jnp.zeros((3 * C,), jnp.float32),                  # qkv_bias=False
        w_proj=0.1 * jax.random.normal(ks[6], (C, C), jnp.float32),
        b_proj=0.05 * jax.random.normal(ks[7], (C,), jnp.float32),
        w_fc1=0.1 * jax.random.normal(ks[8], (C, hidden), jnp.float32),
        b_fc1=0.05 * jax.random.normal(ks[9], (hidden,), jnp.float32),
        w_fc2=0.1 * jax.random.normal(ks[10], (hidden, C), jnp.float32),
        b_fc2=0.05 * jax.random.normal(ks[11], (C,), jnp.float32),
    )

    prepped = prepare_params(params)       # one-time bf16 weight cast

    fwd = jax.jit(functools.partial(block_forward, num_heads=H))
    out = jax.block_until_ready(fwd(x, prepped))
    assert out.shape == (B, N, C), out.shape
    assert bool(jnp.all(jnp.isfinite(out)))

    ref = jax.block_until_ready(block_reference(x, params, num_heads=H))
    max_err = float(jnp.max(jnp.abs(out - ref)))
    assert jnp.allclose(out, ref, atol=3e-3, rtol=3e-3), max_err

    print("KERNEL_OK")
</pallas_src>

<mosaic_0001>
module attributes {stable_mosaic.version = 11 : i64} {
  func.func @kernel(%arg0: i32, %arg1: i32, %arg2: i32, %arg3: memref<16x32xbf16, #tpu.memory_space<vmem>>, %arg4: memref<32x96xbf16, #tpu.memory_space<vmem>>, %arg5: memref<1x96xf32, #tpu.memory_space<vmem>>, %arg6: memref<16x96xbf16, #tpu.memory_space<vmem>>, %arg7: memref<16x96xf32, #tpu.memory_space<vmem>>) attributes {dimension_semantics = [#tpu.dimension_semantics<parallel>, #tpu.dimension_semantics<parallel>, #tpu.dimension_semantics<arbitrary>], iteration_bounds = array<i64: 1, 1, 1>, scalar_prefetch = 0 : i64, scratch_operands = 1 : i64, tpu.core_type = #tpu.core_type<tc>, window_params = [{transform_indices = @transform_0, window_bounds = array<i64: 16, 32>}, {transform_indices = @transform_1, window_bounds = array<i64: 32, 96>}, {transform_indices = @transform_2, window_bounds = array<i64: 1, 96>}, {transform_indices = @transform_3, window_bounds = array<i64: 16, 96>}]} {
    %c0_i32 = arith.constant 0 : i32
    %0 = arith.cmpi eq, %arg2, %c0_i32 : i32
    %1 = arith.extui %0 : i1 to i32
    %c0_i32_0 = arith.constant 0 : i32
    %2 = arith.cmpi ne, %1, %c0_i32_0 : i32
    scf.if %2 {
      %cst_10 = arith.constant 0.000000e+00 : f32
      %12 = vector.broadcast %cst_10 : f32 to vector<16x96xf32>
      %c0_11 = arith.constant 0 : index
      %c0_12 = arith.constant 0 : index
      %13 = vector.load %arg7[%c0_11, %c0_12] : memref<16x96xf32, #tpu.memory_space<vmem>>, vector<16x96xf32>
      tpu.vector_store %arg7[%c0_11, %c0_12], %12 {strides = array<i32>} : memref<16x96xf32, #tpu.memory_space<vmem>>, vector<16x96xf32>,
    } else {
    }
    %c0 = arith.constant 0 : index
    %c0_1 = arith.constant 0 : index
    %3 = vector.load %arg7[%c0, %c0_1] : memref<16x96xf32, #tpu.memory_space<vmem>>, vector<16x96xf32>
    %c0_2 = arith.constant 0 : index
    %c0_3 = arith.constant 0 : index
    %4 = vector.load %arg3[%c0_2, %c0_3] : memref<16x32xbf16, #tpu.memory_space<vmem>>, vector<16x32xbf16>
    %c0_4 = arith.constant 0 : index
    %c0_5 = arith.constant 0 : index
    %5 = vector.load %arg4[%c0_4, %c0_5] : memref<32x96xbf16, #tpu.memory_space<vmem>>, vector<32x96xbf16>
    %cst = arith.constant dense<0.000000e+00> : vector<16x96xf32>
    %6 = tpu.matmul %4, %5, %cst {dimension_numbers = #tpu.dot_dimension_numbers<[1], [0], [0], [1], [0, 0, 1, 1], [], []>} : vector<16x32xbf16>, vector<32x96xbf16>, vector<16x96xf32> -> vector<16x96xf32>
    %7 = arith.addf %3, %6 : vector<16x96xf32>
    %c0_6 = arith.constant 0 : index
    %c0_7 = arith.constant 0 : index
    %8 = vector.load %arg7[%c0_6, %c0_7] : memref<16x96xf32, #tpu.memory_space<vmem>>, vector<16x96xf32>
    tpu.vector_store %arg7[%c0_6, %c0_7], %7 {strides = array<i32>} : memref<16x96xf32, #tpu.memory_space<vmem>>, vector<16x96xf32>,
    %c0_i32_8 = arith.constant 0 : i32
    %9 = arith.cmpi eq, %arg2, %c0_i32_8 : i32
    %10 = arith.extui %9 : i1 to i32
    %c0_i32_9 = arith.constant 0 : i32
    %11 = arith.cmpi ne, %10, %c0_i32_9 : i32
    scf.if %11 {
      %c0_10 = arith.constant 0 : index
      %c0_11 = arith.constant 0 : index
      %12 = vector.load %arg7[%c0_10, %c0_11] : memref<16x96xf32, #tpu.memory_space<vmem>>, vector<16x96xf32>
      %c0_12 = arith.constant 0 : index
      %c0_13 = arith.constant 0 : index
      %13 = vector.load %arg5[%c0_12, %c0_13] : memref<1x96xf32, #tpu.memory_space<vmem>>, vector<1x96xf32>
      %14 = vector.broadcast %13 : vector<1x96xf32> to vector<16x96xf32>
      %15 = arith.addf %12, %14 : vector<16x96xf32>
      %16 = arith.truncf %15 : vector<16x96xf32> to vector<16x96xbf16>
      %c0_14 = arith.constant 0 : index
      %c0_15 = arith.constant 0 : index
      %17 = vector.load %arg6[%c0_14, %c0_15] : memref<16x96xbf16, #tpu.memory_space<vmem>>, vector<16x96xbf16>
      tpu.vector_store %arg6[%c0_14, %c0_15], %16 {strides = array<i32>} : memref<16x96xbf16, #tpu.memory_space<vmem>>, vector<16x96xbf16>,
    } else {
    }
    return
  }
  func.func @transform_0(%arg0: i32, %arg1: i32, %arg2: i32) -> (i32, i32) {
    %c0_i32 = arith.constant 0 : i32
    return %arg0, %arg2 : i32, i32
  }
  func.func @transform_1(%arg0: i32, %arg1: i32, %arg2: i32) -> (i32, i32) {
    %c0_i32 = arith.constant 0 : i32
    return %arg2, %arg1 : i32, i32
  }
  func.func @transform_2(%arg0: i32, %arg1: i32, %arg2: i32) -> (i32, i32) {
    %c0_i32 = arith.constant 0 : i32
    %c0_i32_0 = arith.constant 0 : i32
    return %c0_i32, %arg1 : i32, i32
  }
  func.func @transform_3(%arg0: i32, %arg1: i32, %arg2: i32) -> (i32, i32) {
    %c0_i32 = arith.constant 0 : i32
    return %arg0, %arg1 : i32, i32
  }
}

module attributes {stable_mosaic.version = 11 : i64} {
  func.func @kernel(%arg0: i32, %arg1: i32, %arg2: i32, %arg3: memref<16x32xbf16, #tpu.memory_space<vmem>>, %arg4: memref<32x32xbf16, #tpu.memory_space<vmem>>, %arg5: memref<1x32xf32, #tpu.memory_space<vmem>>, %arg6: memref<16x32xf32, #tpu.memory_space<vmem>>, %arg7: memref<16x32xf32, #tpu.memory_space<vmem>>, %arg8: memref<16x32xf32, #tpu.memory_space<vmem>>) attributes {dimension_semantics = [#tpu.dimension_semantics<parallel>, #tpu.dimension_semantics<parallel>, #tpu.dimension_semantics<arbitrary>], iteration_bounds = array<i64: 1, 1, 1>, scalar_prefetch = 0 : i64, scratch_operands = 1 : i64, tpu.core_type = #tpu.core_type<tc>, window_params = [{transform_indices = @transform_0, window_bounds = array<i64: 16, 32>}, {transform_indices = @transform_1, window_bounds = array<i64: 32, 32>}, {transform_indices = @transform_2, window_bounds = array<i64: 1, 32>}, {transform_indices = @transform_3, window_bounds = array<i64: 16, 32>}, {transform_indices = @transform_4, window_bounds = array<i64: 16, 32>}]} {
    %c0_i32 = arith.constant 0 : i32
    %0 = arith.cmpi eq, %arg2, %c0_i32 : i32
    %1 = arith.extui %0 : i1 to i32
    %c0_i32_0 = arith.constant 0 : i32
    %2 = arith.cmpi ne, %1, %c0_i32_0 : i32
    scf.if %2 {
      %cst_10 = arith.constant 0.000000e+00 : f32
      %12 = vector.broadcast %cst_10 : f32 to vector<16x32xf32>
      %c0_11 = arith.constant 0 : index
      %c0_12 = arith.constant 0 : index
      %13 = vector.load %arg8[%c0_11, %c0_12] : memref<16x32xf32, #tpu.memory_space<vmem>>, vector<16x32xf32>
      tpu.vector_store %arg8[%c0_11, %c0_12], %12 {strides = array<i32>} : memref<16x32xf32, #tpu.memory_space<vmem>>, vector<16x32xf32>,
    } else {
    }
    %c0 = arith.constant 0 : index
    %c0_1 = arith.constant 0 : index
    %3 = vector.load %arg8[%c0, %c0_1] : memref<16x32xf32, #tpu.memory_space<vmem>>, vector<16x32xf32>
    %c0_2 = arith.constant 0 : index
    %c0_3 = arith.constant 0 : index
    %4 = vector.load %arg3[%c0_2, %c0_3] : memref<16x32xbf16, #tpu.memory_space<vmem>>, vector<16x32xbf16>
    %c0_4 = arith.constant 0 : index
    %c0_5 = arith.constant 0 : index
    %5 = vector.load %arg4[%c0_4, %c0_5] : memref<32x32xbf16, #tpu.memory_space<vmem>>, vector<32x32xbf16>
    %cst = arith.constant dense<0.000000e+00> : vector<16x32xf32>
    %6 = tpu.matmul %4, %5, %cst {dimension_numbers = #tpu.dot_dimension_numbers<[1], [0], [0], [1], [0, 0, 1, 1], [], []>} : vector<16x32xbf16>, vector<32x32xbf16>, vector<16x32xf32> -> vector<16x32xf32>
    %7 = arith.addf %3, %6 : vector<16x32xf32>
    %c0_6 = arith.constant 0 : index
    %c0_7 = arith.constant 0 : index
    %8 = vector.load %arg8[%c0_6, %c0_7] : memref<16x32xf32, #tpu.memory_space<vmem>>, vector<16x32xf32>
    tpu.vector_store %arg8[%c0_6, %c0_7], %7 {strides = array<i32>} : memref<16x32xf32, #tpu.memory_space<vmem>>, vector<16x32xf32>,
    %c0_i32_8 = arith.constant 0 : i32
    %9 = arith.cmpi eq, %arg2, %c0_i32_8 : i32
    %10 = arith.extui %9 : i1 to i32
    %c0_i32_9 = arith.constant 0 : i32
    %11 = arith.cmpi ne, %10, %c0_i32_9 : i32
    scf.if %11 {
      %c0_10 = arith.constant 0 : index
      %c0_11 = arith.constant 0 : index
      %12 = vector.load %arg8[%c0_10, %c0_11] : memref<16x32xf32, #tpu.memory_space<vmem>>, vector<16x32xf32>
      %c0_12 = arith.constant 0 : index
      %c0_13 = arith.constant 0 : index
      %13 = vector.load %arg5[%c0_12, %c0_13] : memref<1x32xf32, #tpu.memory_space<vmem>>, vector<1x32xf32>
      %14 = vector.broadcast %13 : vector<1x32xf32> to vector<16x32xf32>
      %15 = arith.addf %12, %14 : vector<16x32xf32>
      %c0_14 = arith.constant 0 : index
      %c0_15 = arith.constant 0 : index
      %16 = vector.load %arg6[%c0_14, %c0_15] : memref<16x32xf32, #tpu.memory_space<vmem>>, vector<16x32xf32>
      %17 = arith.addf %15, %16 : vector<16x32xf32>
      %c0_16 = arith.constant 0 : index
      %c0_17 = arith.constant 0 : index
      %18 = vector.load %arg7[%c0_16, %c0_17] : memref<16x32xf32, #tpu.memory_space<vmem>>, vector<16x32xf32>
      tpu.vector_store %arg7[%c0_16, %c0_17], %17 {strides = array<i32>} : memref<16x32xf32, #tpu.memory_space<vmem>>, vector<16x32xf32>,
    } else {
    }
    return
  }
  func.func @transform_0(%arg0: i32, %arg1: i32, %arg2: i32) -> (i32, i32) {
    %c0_i32 = arith.constant 0 : i32
    return %arg0, %arg2 : i32, i32
  }
  func.func @transform_1(%arg0: i32, %arg1: i32, %arg2: i32) -> (i32, i32) {
    %c0_i32 = arith.constant 0 : i32
    return %arg2, %arg1 : i32, i32
  }
  func.func @transform_2(%arg0: i32, %arg1: i32, %arg2: i32) -> (i32, i32) {
    %c0_i32 = arith.constant 0 : i32
    %c0_i32_0 = arith.constant 0 : i32
    return %c0_i32, %arg1 : i32, i32
  }
  func.func @transform_3(%arg0: i32, %arg1: i32, %arg2: i32) -> (i32, i32) {
    %c0_i32 = arith.constant 0 : i32
    return %arg0, %arg1 : i32, i32
  }
  func.func @transform_4(%arg0: i32, %arg1: i32, %arg2: i32) -> (i32, i32) {
    %c0_i32 = arith.constant 0 : i32
    return %arg0, %arg1 : i32, i32
  }
}

module attributes {stable_mosaic.version = 11 : i64} {
  func.func @_double_ln_kernel(%arg0: i32, %arg1: memref<16x32xf32, #tpu.memory_space<vmem>>, %arg2: memref<1x32xf32, #tpu.memory_space<vmem>>, %arg3: memref<1x32xf32, #tpu.memory_space<vmem>>, %arg4: memref<16x32xf32, #tpu.memory_space<vmem>>, %arg5: memref<16x32xbf16, #tpu.memory_space<vmem>>) attributes {dimension_semantics = [#tpu.dimension_semantics<parallel>], iteration_bounds = array<i64: 1>, scalar_prefetch = 0 : i64, scratch_operands = 0 : i64, tpu.core_type = #tpu.core_type<tc>, window_params = [{transform_indices = @transform_0, window_bounds = array<i64: 16, 32>}, {pipeline_mode = #tpu.pipeline_mode<synchronous>, transform_indices = @transform_1, window_bounds = array<i64: 1, 32>}, {pipeline_mode = #tpu.pipeline_mode<synchronous>, transform_indices = @transform_2, window_bounds = array<i64: 1, 32>}, {transform_indices = @transform_3, window_bounds = array<i64: 16, 32>}, {transform_indices = @transform_4, window_bounds = array<i64: 16, 32>}]} {
    %c0 = arith.constant 0 : index
    %c0_0 = arith.constant 0 : index
    %0 = vector.load %arg1[%c0, %c0_0] : memref<16x32xf32, #tpu.memory_space<vmem>>, vector<16x32xf32>
    %c0_1 = arith.constant 0 : index
    %c0_2 = arith.constant 0 : index
    %1 = vector.load %arg2[%c0_1, %c0_2] : memref<1x32xf32, #tpu.memory_space<vmem>>, vector<1x32xf32>
    %c0_3 = arith.constant 0 : index
    %c0_4 = arith.constant 0 : index
    %2 = vector.load %arg3[%c0_3, %c0_4] : memref<1x32xf32, #tpu.memory_space<vmem>>, vector<1x32xf32>
    %cst = arith.constant dense<0.000000e+00> : vector<16xf32>
    %3 = vector.multi_reduction <add>, %0, %cst [1] : vector<16x32xf32> to vector<16xf32>
    %4 = vector.shape_cast %3 : vector<16xf32> to vector<16x1xf32>
    %cst_5 = arith.constant 3.200000e+01 : f32
    %5 = vector.broadcast %cst_5 : f32 to vector<16x1xf32>
    %6 = arith.divf %4, %5 : vector<16x1xf32>
    %7 = vector.broadcast %6 : vector<16x1xf32> to vector<16x32xf32>
    %8 = arith.subf %0, %7 : vector<16x32xf32>
    %9 = arith.mulf %8, %8 : vector<16x32xf32>
    %cst_6 = arith.constant dense<0.000000e+00> : vector<16xf32>
    %10 = vector.multi_reduction <add>, %9, %cst_6 [1] : vector<16x32xf32> to vector<16xf32>
    %11 = vector.shape_cast %10 : vector<16xf32> to vector<16x1xf32>
    %cst_7 = arith.constant 3.200000e+01 : f32
    %12 = vector.broadcast %cst_7 : f32 to vector<16x1xf32>
    %13 = arith.divf %11, %12 : vector<16x1xf32>
    %cst_8 = arith.constant 9.99999974E-6 : f32
    %14 = vector.broadcast %cst_8 : f32 to vector<16x1xf32>
    %15 = arith.addf %13, %14 : vector<16x1xf32>
    %16 = math.rsqrt %15 : vector<16x1xf32>
    %17 = vector.broadcast %16 : vector<16x1xf32> to vector<16x32xf32>
    %18 = arith.mulf %8, %17 : vector<16x32xf32>
    %19 = vector.broadcast %1 : vector<1x32xf32> to vector<16x32xf32>
    %20 = arith.mulf %18, %19 : vector<16x32xf32>
    %21 = vector.broadcast %2 : vector<1x32xf32> to vector<16x32xf32>
    %22 = arith.addf %20, %21 : vector<16x32xf32>
    %cst_9 = arith.constant dense<0.000000e+00> : vector<16xf32>
    %23 = vector.multi_reduction <add>, %22, %cst_9 [1] : vector<16x32xf32> to vector<16xf32>
    %24 = vector.shape_cast %23 : vector<16xf32> to vector<16x1xf32>
    %cst_10 = arith.constant 3.200000e+01 : f32
    %25 = vector.broadcast %cst_10 : f32 to vector<16x1xf32>
    %26 = arith.divf %24, %25 : vector<16x1xf32>
    %27 = vector.broadcast %26 : vector<16x1xf32> to vector<16x32xf32>
    %28 = arith.subf %22, %27 : vector<16x32xf32>
    %29 = arith.mulf %28, %28 : vector<16x32xf32>
    %cst_11 = arith.constant dense<0.000000e+00> : vector<16xf32>
    %30 = vector.multi_reduction <add>, %29, %cst_11 [1] : vector<16x32xf32> to vector<16xf32>
    %31 = vector.shape_cast %30 : vector<16xf32> to vector<16x1xf32>
    %cst_12 = arith.constant 3.200000e+01 : f32
    %32 = vector.broadcast %cst_12 : f32 to vector<16x1xf32>
    %33 = arith.divf %31, %32 : vector<16x1xf32>
    %cst_13 = arith.constant 9.99999974E-6 : f32
    %34 = vector.broadcast %cst_13 : f32 to vector<16x1xf32>
    %35 = arith.addf %33, %34 : vector<16x1xf32>
    %36 = math.rsqrt %35 : vector<16x1xf32>
    %37 = vector.broadcast %36 : vector<16x1xf32> to vector<16x32xf32>
    %38 = arith.mulf %28, %37 : vector<16x32xf32>
    %39 = vector.broadcast %1 : vector<1x32xf32> to vector<16x32xf32>
    %40 = arith.mulf %38, %39 : vector<16x32xf32>
    %41 = vector.broadcast %2 : vector<1x32xf32> to vector<16x32xf32>
    %42 = arith.addf %40, %41 : vector<16x32xf32>
    %c0_14 = arith.constant 0 : index
    %c0_15 = arith.constant 0 : index
    %43 = vector.load %arg4[%c0_14, %c0_15] : memref<16x32xf32, #tpu.memory_space<vmem>>, vector<16x32xf32>
    tpu.vector_store %arg4[%c0_14, %c0_15], %22 {strides = array<i32>} : memref<16x32xf32, #tpu.memory_space<vmem>>, vector<16x32xf32>,
    %44 = arith.truncf %42 : vector<16x32xf32> to vector<16x32xbf16>
    %c0_16 = arith.constant 0 : index
    %c0_17 = arith.constant 0 : index
    %45 = vector.load %arg5[%c0_16, %c0_17] : memref<16x32xbf16, #tpu.memory_space<vmem>>, vector<16x32xbf16>
    tpu.vector_store %arg5[%c0_16, %c0_17], %44 {strides = array<i32>} : memref<16x32xbf16, #tpu.memory_space<vmem>>, vector<16x32xbf16>,
    return
  }
  func.func @transform_0(%arg0: i32) -> (i32, i32) {
    %c0_i32 = arith.constant 0 : i32
    %c0_i32_0 = arith.constant 0 : i32
    return %arg0, %c0_i32 : i32, i32
  }
  func.func @transform_1(%arg0: i32) -> (i32, i32) {
    %c0_i32 = arith.constant 0 : i32
    %c0_i32_0 = arith.constant 0 : i32
    %c0_i32_1 = arith.constant 0 : i32
    return %c0_i32, %c0_i32_0 : i32, i32
  }
  func.func @transform_2(%arg0: i32) -> (i32, i32) {
    %c0_i32 = arith.constant 0 : i32
    %c0_i32_0 = arith.constant 0 : i32
    %c0_i32_1 = arith.constant 0 : i32
    return %c0_i32, %c0_i32_0 : i32, i32
  }
  func.func @transform_3(%arg0: i32) -> (i32, i32) {
    %c0_i32 = arith.constant 0 : i32
    %c0_i32_0 = arith.constant 0 : i32
    return %arg0, %c0_i32 : i32, i32
  }
  func.func @transform_4(%arg0: i32) -> (i32, i32) {
    %c0_i32 = arith.constant 0 : i32
    %c0_i32_0 = arith.constant 0 : i32
    return %arg0, %c0_i32 : i32, i32
  }
}

module attributes {stable_mosaic.version = 11 : i64} {
  func.func @_attention_kernel(%arg0: i32, %arg1: memref<1x8x96xbf16, #tpu.memory_space<vmem>>, %arg2: memref<1x8x32xbf16, #tpu.memory_space<vmem>>) attributes {dimension_semantics = [#tpu.dimension_semantics<parallel>], iteration_bounds = array<i64: 2>, scalar_prefetch = 0 : i64, scratch_operands = 0 : i64, tpu.core_type = #tpu.core_type<tc>, window_params = [{transform_indices = @transform_0, window_bounds = array<i64: 1, 8, 96>}, {transform_indices = @transform_1, window_bounds = array<i64: 1, 8, 32>}]} {
    %c0 = arith.constant 0 : index
    %c0_0 = arith.constant 0 : index
    %c0_1 = arith.constant 0 : index
    %0 = vector.load %arg1[%c0, %c0_0, %c0_1] : memref<1x8x96xbf16, #tpu.memory_space<vmem>>, vector<1x8x96xbf16>
    %1 = vector.shape_cast %0 : vector<1x8x96xbf16> to vector<8x96xbf16>
    %2 = vector.extract_strided_slice %1 {offsets = [0, 0], sizes = [8, 8], strides = [1, 1]} : vector<8x96xbf16> to vector<8x8xbf16>
    %3 = vector.extract_strided_slice %1 {offsets = [0, 32], sizes = [8, 8], strides = [1, 1]} : vector<8x96xbf16> to vector<8x8xbf16>
    %4 = vector.extract_strided_slice %1 {offsets = [0, 64], sizes = [8, 8], strides = [1, 1]} : vector<8x96xbf16> to vector<8x8xbf16>
    %cst = arith.constant dense<0.000000e+00> : vector<8x8xf32>
    %5 = tpu.matmul %2, %3, %cst {dimension_numbers = #tpu.dot_dimension_numbers<[1], [1], [0], [0], [0, 0, 1, 0], [], []>} : vector<8x8xbf16>, vector<8x8xbf16>, vector<8x8xf32> -> vector<8x8xf32>
    %cst_2 = arith.constant 0.353553385 : f32
    %6 = vector.broadcast %cst_2 : f32 to vector<8x8xf32>
    %7 = arith.mulf %5, %6 : vector<8x8xf32>
    %cst_3 = arith.constant dense<0xFF800000> : vector<8xf32>
    %8 = vector.multi_reduction <maximumf>, %7, %cst_3 [1] : vector<8x8xf32> to vector<8xf32>
    %9 = vector.shape_cast %8 : vector<8xf32> to vector<8x1xf32>
    %10 = vector.broadcast %9 : vector<8x1xf32> to vector<8x8xf32>
    %11 = arith.subf %7, %10 : vector<8x8xf32>
    %12 = math.exp %11 : vector<8x8xf32>
    %cst_4 = arith.constant dense<0.000000e+00> : vector<8xf32>
    %13 = vector.multi_reduction <add>, %12, %cst_4 [1] : vector<8x8xf32> to vector<8xf32>
    %14 = vector.shape_cast %13 : vector<8xf32> to vector<8x1xf32>
    %15 = tpu.reciprocal %14 {approx = true} : vector<8x1xf32> -> vector<8x1xf32>
    %16 = vector.broadcast %15 : vector<8x1xf32> to vector<8x8xf32>
    %17 = arith.mulf %12, %16 : vector<8x8xf32>
    %18 = arith.truncf %17 : vector<8x8xf32> to vector<8x8xbf16>
    %cst_5 = arith.constant dense<0.000000e+00> : vector<8x8xf32>
    %19 = tpu.matmul %18, %4, %cst_5 {dimension_numbers = #tpu.dot_dimension_numbers<[1], [0], [0], [1], [0, 0, 1, 1], [], []>} : vector<8x8xbf16>, vector<8x8xbf16>, vector<8x8xf32> -> vector<8x8xf32>
    %20 = arith.truncf %19 : vector<8x8xf32> to vector<8x8xbf16>
    %c0_6 = arith.constant 0 : index
    %c0_7 = arith.constant 0 : index
    %c0_8 = arith.constant 0 : index
    %21 = vector.load %arg2[%c0_6, %c0_7, %c0_8] : memref<1x8x32xbf16, #tpu.memory_space<vmem>>, vector<1x8x8xbf16>
    %22 = vector.shape_cast %21 : vector<1x8x8xbf16> to vector<8x8xbf16>
    %23 = vector.shape_cast %20 : vector<8x8xbf16> to vector<1x8x8xbf16>
    tpu.vector_store %arg2[%c0_6, %c0_7, %c0_8], %23 {strides = array<i32>} : memref<1x8x32xbf16, #tpu.memory_space<vmem>>, vector<1x8x8xbf16>,
    %24 = vector.extract_strided_slice %1 {offsets = [0, 8], sizes = [8, 8], strides = [1, 1]} : vector<8x96xbf16> to vector<8x8xbf16>
    %25 = vector.extract_strided_slice %1 {offsets = [0, 40], sizes = [8, 8], strides = [1, 1]} : vector<8x96xbf16> to vector<8x8xbf16>
    %26 = vector.extract_strided_slice %1 {offsets = [0, 72], sizes = [8, 8], strides = [1, 1]} : vector<8x96xbf16> to vector<8x8xbf16>
    %cst_9 = arith.constant dense<0.000000e+00> : vector<8x8xf32>
    %27 = tpu.matmul %24, %25, %cst_9 {dimension_numbers = #tpu.dot_dimension_numbers<[1], [1], [0], [0], [0, 0, 1, 0], [], []>} : vector<8x8xbf16>, vector<8x8xbf16>, vector<8x8xf32> -> vector<8x8xf32>
    %cst_10 = arith.constant 0.353553385 : f32
    %28 = vector.broadcast %cst_10 : f32 to vector<8x8xf32>
    %29 = arith.mulf %27, %28 : vector<8x8xf32>
    %cst_11 = arith.constant dense<0xFF800000> : vector<8xf32>
    %30 = vector.multi_reduction <maximumf>, %29, %cst_11 [1] : vector<8x8xf32> to vector<8xf32>
    %31 = vector.shape_cast %30 : vector<8xf32> to vector<8x1xf32>
    %32 = vector.broadcast %31 : vector<8x1xf32> to vector<8x8xf32>
    %33 = arith.subf %29, %32 : vector<8x8xf32>
    %34 = math.exp %33 : vector<8x8xf32>
    %cst_12 = arith.constant dense<0.000000e+00> : vector<8xf32>
    %35 = vector.multi_reduction <add>, %34, %cst_12 [1] : vector<8x8xf32> to vector<8xf32>
    %36 = vector.shape_cast %35 : vector<8xf32> to vector<8x1xf32>
    %37 = tpu.reciprocal %36 {approx = true} : vector<8x1xf32> -> vector<8x1xf32>
    %38 = vector.broadcast %37 : vector<8x1xf32> to vector<8x8xf32>
    %39 = arith.mulf %34, %38 : vector<8x8xf32>
    %40 = arith.truncf %39 : vector<8x8xf32> to vector<8x8xbf16>
    %cst_13 = arith.constant dense<0.000000e+00> : vector<8x8xf32>
    %41 = tpu.matmul %40, %26, %cst_13 {dimension_numbers = #tpu.dot_dimension_numbers<[1], [0], [0], [1], [0, 0, 1, 1], [], []>} : vector<8x8xbf16>, vector<8x8xbf16>, vector<8x8xf32> -> vector<8x8xf32>
    %42 = arith.truncf %41 : vector<8x8xf32> to vector<8x8xbf16>
    %c0_14 = arith.constant 0 : index
    %c0_15 = arith.constant 0 : index
    %c8 = arith.constant 8 : index
    %43 = vector.load %arg2[%c0_14, %c0_15, %c8] : memref<1x8x32xbf16, #tpu.memory_space<vmem>>, vector<1x8x8xbf16>
    %44 = vector.shape_cast %43 : vector<1x8x8xbf16> to vector<8x8xbf16>
    %45 = vector.shape_cast %42 : vector<8x8xbf16> to vector<1x8x8xbf16>
    tpu.vector_store %arg2[%c0_14, %c0_15, %c8], %45 {strides = array<i32>} : memref<1x8x32xbf16, #tpu.memory_space<vmem>>, vector<1x8x8xbf16>,
    %46 = vector.extract_strided_slice %1 {offsets = [0, 16], sizes = [8, 8], strides = [1, 1]} : vector<8x96xbf16> to vector<8x8xbf16>
    %47 = vector.extract_strided_slice %1 {offsets = [0, 48], sizes = [8, 8], strides = [1, 1]} : vector<8x96xbf16> to vector<8x8xbf16>
    %48 = vector.extract_strided_slice %1 {offsets = [0, 80], sizes = [8, 8], strides = [1, 1]} : vector<8x96xbf16> to vector<8x8xbf16>
    %cst_16 = arith.constant dense<0.000000e+00> : vector<8x8xf32>
    %49 = tpu.matmul %46, %47, %cst_16 {dimension_numbers = #tpu.dot_dimension_numbers<[1], [1], [0], [0], [0, 0, 1, 0], [], []>} : vector<8x8xbf16>, vector<8x8xbf16>, vector<8x8xf32> -> vector<8x8xf32>
    %cst_17 = arith.constant 0.353553385 : f32
    %50 = vector.broadcast %cst_17 : f32 to vector<8x8xf32>
    %51 = arith.mulf %49, %50 : vector<8x8xf32>
    %cst_18 = arith.constant dense<0xFF800000> : vector<8xf32>
    %52 = vector.multi_reduction <maximumf>, %51, %cst_18 [1] : vector<8x8xf32> to vector<8xf32>
    %53 = vector.shape_cast %52 : vector<8xf32> to vector<8x1xf32>
    %54 = vector.broadcast %53 : vector<8x1xf32> to vector<8x8xf32>
    %55 = arith.subf %51, %54 : vector<8x8xf32>
    %56 = math.exp %55 : vector<8x8xf32>
    %cst_19 = arith.constant dense<0.000000e+00> : vector<8xf32>
    %57 = vector.multi_reduction <add>, %56, %cst_19 [1] : vector<8x8xf32> to vector<8xf32>
    %58 = vector.shape_cast %57 : vector<8xf32> to vector<8x1xf32>
    %59 = tpu.reciprocal %58 {approx = true} : vector<8x1xf32> -> vector<8x1xf32>
    %60 = vector.broadcast %59 : vector<8x1xf32> to vector<8x8xf32>
    %61 = arith.mulf %56, %60 : vector<8x8xf32>
    %62 = arith.truncf %61 : vector<8x8xf32> to vector<8x8xbf16>
    %cst_20 = arith.constant dense<0.000000e+00> : vector<8x8xf32>
    %63 = tpu.matmul %62, %48, %cst_20 {dimension_numbers = #tpu.dot_dimension_numbers<[1], [0], [0], [1], [0, 0, 1, 1], [], []>} : vector<8x8xbf16>, vector<8x8xbf16>, vector<8x8xf32> -> vector<8x8xf32>
    %64 = arith.truncf %63 : vector<8x8xf32> to vector<8x8xbf16>
    %c0_21 = arith.constant 0 : index
    %c0_22 = arith.constant 0 : index
    %c16 = arith.constant 16 : index
    %65 = vector.load %arg2[%c0_21, %c0_22, %c16] : memref<1x8x32xbf16, #tpu.memory_space<vmem>>, vector<1x8x8xbf16>
    %66 = vector.shape_cast %65 : vector<1x8x8xbf16> to vector<8x8xbf16>
    %67 = vector.shape_cast %64 : vector<8x8xbf16> to vector<1x8x8xbf16>
    tpu.vector_store %arg2[%c0_21, %c0_22, %c16], %67 {strides = array<i32>} : memref<1x8x32xbf16, #tpu.memory_space<vmem>>, vector<1x8x8xbf16>,
    %68 = vector.extract_strided_slice %1 {offsets = [0, 24], sizes = [8, 8], strides = [1, 1]} : vector<8x96xbf16> to vector<8x8xbf16>
    %69 = vector.extract_strided_slice %1 {offsets = [0, 56], sizes = [8, 8], strides = [1, 1]} : vector<8x96xbf16> to vector<8x8xbf16>
    %70 = vector.extract_strided_slice %1 {offsets = [0, 88], sizes = [8, 8], strides = [1, 1]} : vector<8x96xbf16> to vector<8x8xbf16>
    %cst_23 = arith.constant dense<0.000000e+00> : vector<8x8xf32>
    %71 = tpu.matmul %68, %69, %cst_23 {dimension_numbers = #tpu.dot_dimension_numbers<[1], [1], [0], [0], [0, 0, 1, 0], [], []>} : vector<8x8xbf16>, vector<8x8xbf16>, vector<8x8xf32> -> vector<8x8xf32>
    %cst_24 = arith.constant 0.353553385 : f32
    %72 = vector.broadcast %cst_24 : f32 to vector<8x8xf32>
    %73 = arith.mulf %71, %72 : vector<8x8xf32>
    %cst_25 = arith.constant dense<0xFF800000> : vector<8xf32>
    %74 = vector.multi_reduction <maximumf>, %73, %cst_25 [1] : vector<8x8xf32> to vector<8xf32>
    %75 = vector.shape_cast %74 : vector<8xf32> to vector<8x1xf32>
    %76 = vector.broadcast %75 : vector<8x1xf32> to vector<8x8xf32>
    %77 = arith.subf %73, %76 : vector<8x8xf32>
    %78 = math.exp %77 : vector<8x8xf32>
    %cst_26 = arith.constant dense<0.000000e+00> : vector<8xf32>
    %79 = vector.multi_reduction <add>, %78, %cst_26 [1] : vector<8x8xf32> to vector<8xf32>
    %80 = vector.shape_cast %79 : vector<8xf32> to vector<8x1xf32>
    %81 = tpu.reciprocal %80 {approx = true} : vector<8x1xf32> -> vector<8x1xf32>
    %82 = vector.broadcast %81 : vector<8x1xf32> to vector<8x8xf32>
    %83 = arith.mulf %78, %82 : vector<8x8xf32>
    %84 = arith.truncf %83 : vector<8x8xf32> to vector<8x8xbf16>
    %cst_27 = arith.constant dense<0.000000e+00> : vector<8x8xf32>
    %85 = tpu.matmul %84, %70, %cst_27 {dimension_numbers = #tpu.dot_dimension_numbers<[1], [0], [0], [1], [0, 0, 1, 1], [], []>} : vector<8x8xbf16>, vector<8x8xbf16>, vector<8x8xf32> -> vector<8x8xf32>
    %86 = arith.truncf %85 : vector<8x8xf32> to vector<8x8xbf16>
    %c0_28 = arith.constant 0 : index
    %c0_29 = arith.constant 0 : index
    %c24 = arith.constant 24 : index
    %87 = vector.load %arg2[%c0_28, %c0_29, %c24] : memref<1x8x32xbf16, #tpu.memory_space<vmem>>, vector<1x8x8xbf16>
    %88 = vector.shape_cast %87 : vector<1x8x8xbf16> to vector<8x8xbf16>
    %89 = vector.shape_cast %86 : vector<8x8xbf16> to vector<1x8x8xbf16>
    tpu.vector_store %arg2[%c0_28, %c0_29, %c24], %89 {strides = array<i32>} : memref<1x8x32xbf16, #tpu.memory_space<vmem>>, vector<1x8x8xbf16>,
    return
  }
  func.func @transform_0(%arg0: i32) -> (i32, i32, i32) {
    %c0_i32 = arith.constant 0 : i32
    %c0_i32_0 = arith.constant 0 : i32
    %c0_i32_1 = arith.constant 0 : i32
    return %arg0, %c0_i32, %c0_i32_0 : i32, i32, i32
  }
  func.func @transform_1(%arg0: i32) -> (i32, i32, i32) {
    %c0_i32 = arith.constant 0 : i32
    %c0_i32_0 = arith.constant 0 : i32
    %c0_i32_1 = arith.constant 0 : i32
    return %arg0, %c0_i32, %c0_i32_0 : i32, i32, i32
  }
}

module attributes {stable_mosaic.version = 11 : i64} {
  func.func @_single_ln_kernel(%arg0: i32, %arg1: memref<16x32xf32, #tpu.memory_space<vmem>>, %arg2: memref<1x32xf32, #tpu.memory_space<vmem>>, %arg3: memref<1x32xf32, #tpu.memory_space<vmem>>, %arg4: memref<16x32xbf16, #tpu.memory_space<vmem>>) attributes {dimension_semantics = [#tpu.dimension_semantics<parallel>], iteration_bounds = array<i64: 1>, scalar_prefetch = 0 : i64, scratch_operands = 0 : i64, tpu.core_type = #tpu.core_type<tc>, window_params = [{transform_indices = @transform_0, window_bounds = array<i64: 16, 32>}, {pipeline_mode = #tpu.pipeline_mode<synchronous>, transform_indices = @transform_1, window_bounds = array<i64: 1, 32>}, {pipeline_mode = #tpu.pipeline_mode<synchronous>, transform_indices = @transform_2, window_bounds = array<i64: 1, 32>}, {transform_indices = @transform_3, window_bounds = array<i64: 16, 32>}]} {
    %c0 = arith.constant 0 : index
    %c0_0 = arith.constant 0 : index
    %0 = vector.load %arg1[%c0, %c0_0] : memref<16x32xf32, #tpu.memory_space<vmem>>, vector<16x32xf32>
    %c0_1 = arith.constant 0 : index
    %c0_2 = arith.constant 0 : index
    %1 = vector.load %arg2[%c0_1, %c0_2] : memref<1x32xf32, #tpu.memory_space<vmem>>, vector<1x32xf32>
    %c0_3 = arith.constant 0 : index
    %c0_4 = arith.constant 0 : index
    %2 = vector.load %arg3[%c0_3, %c0_4] : memref<1x32xf32, #tpu.memory_space<vmem>>, vector<1x32xf32>
    %cst = arith.constant dense<0.000000e+00> : vector<16xf32>
    %3 = vector.multi_reduction <add>, %0, %cst [1] : vector<16x32xf32> to vector<16xf32>
    %4 = vector.shape_cast %3 : vector<16xf32> to vector<16x1xf32>
    %cst_5 = arith.constant 3.200000e+01 : f32
    %5 = vector.broadcast %cst_5 : f32 to vector<16x1xf32>
    %6 = arith.divf %4, %5 : vector<16x1xf32>
    %7 = vector.broadcast %6 : vector<16x1xf32> to vector<16x32xf32>
    %8 = arith.subf %0, %7 : vector<16x32xf32>
    %9 = arith.mulf %8, %8 : vector<16x32xf32>
    %cst_6 = arith.constant dense<0.000000e+00> : vector<16xf32>
    %10 = vector.multi_reduction <add>, %9, %cst_6 [1] : vector<16x32xf32> to vector<16xf32>
    %11 = vector.shape_cast %10 : vector<16xf32> to vector<16x1xf32>
    %cst_7 = arith.constant 3.200000e+01 : f32
    %12 = vector.broadcast %cst_7 : f32 to vector<16x1xf32>
    %13 = arith.divf %11, %12 : vector<16x1xf32>
    %cst_8 = arith.constant 9.99999974E-6 : f32
    %14 = vector.broadcast %cst_8 : f32 to vector<16x1xf32>
    %15 = arith.addf %13, %14 : vector<16x1xf32>
    %16 = math.rsqrt %15 : vector<16x1xf32>
    %17 = vector.broadcast %16 : vector<16x1xf32> to vector<16x32xf32>
    %18 = arith.mulf %8, %17 : vector<16x32xf32>
    %19 = vector.broadcast %1 : vector<1x32xf32> to vector<16x32xf32>
    %20 = arith.mulf %18, %19 : vector<16x32xf32>
    %21 = vector.broadcast %2 : vector<1x32xf32> to vector<16x32xf32>
    %22 = arith.addf %20, %21 : vector<16x32xf32>
    %23 = arith.truncf %22 : vector<16x32xf32> to vector<16x32xbf16>
    %c0_9 = arith.constant 0 : index
    %c0_10 = arith.constant 0 : index
    %24 = vector.load %arg4[%c0_9, %c0_10] : memref<16x32xbf16, #tpu.memory_space<vmem>>, vector<16x32xbf16>
    tpu.vector_store %arg4[%c0_9, %c0_10], %23 {strides = array<i32>} : memref<16x32xbf16, #tpu.memory_space<vmem>>, vector<16x32xbf16>,
    return
  }
  func.func @transform_0(%arg0: i32) -> (i32, i32) {
    %c0_i32 = arith.constant 0 : i32
    %c0_i32_0 = arith.constant 0 : i32
    return %arg0, %c0_i32 : i32, i32
  }
  func.func @transform_1(%arg0: i32) -> (i32, i32) {
    %c0_i32 = arith.constant 0 : i32
    %c0_i32_0 = arith.constant 0 : i32
    %c0_i32_1 = arith.constant 0 : i32
    return %c0_i32, %c0_i32_0 : i32, i32
  }
  func.func @transform_2(%arg0: i32) -> (i32, i32) {
    %c0_i32 = arith.constant 0 : i32
    %c0_i32_0 = arith.constant 0 : i32
    %c0_i32_1 = arith.constant 0 : i32
    return %c0_i32, %c0_i32_0 : i32, i32
  }
  func.func @transform_3(%arg0: i32) -> (i32, i32) {
    %c0_i32 = arith.constant 0 : i32
    %c0_i32_0 = arith.constant 0 : i32
    return %arg0, %c0_i32 : i32, i32
  }
}

module attributes {stable_mosaic.version = 11 : i64} {
  func.func @kernel(%arg0: i32, %arg1: i32, %arg2: i32, %arg3: memref<16x128xbf16, #tpu.memory_space<vmem>>, %arg4: memref<128x32xbf16, #tpu.memory_space<vmem>>, %arg5: memref<1x32xf32, #tpu.memory_space<vmem>>, %arg6: memref<16x32xf32, #tpu.memory_space<vmem>>, %arg7: memref<16x32xf32, #tpu.memory_space<vmem>>, %arg8: memref<16x32xf32, #tpu.memory_space<vmem>>) attributes {dimension_semantics = [#tpu.dimension_semantics<parallel>, #tpu.dimension_semantics<parallel>, #tpu.dimension_semantics<arbitrary>], iteration_bounds = array<i64: 1, 1, 1>, scalar_prefetch = 0 : i64, scratch_operands = 1 : i64, tpu.core_type = #tpu.core_type<tc>, window_params = [{transform_indices = @transform_0, window_bounds = array<i64: 16, 128>}, {transform_indices = @transform_1, window_bounds = array<i64: 128, 32>}, {transform_indices = @transform_2, window_bounds = array<i64: 1, 32>}, {transform_indices = @transform_3, window_bounds = array<i64: 16, 32>}, {transform_indices = @transform_4, window_bounds = array<i64: 16, 32>}]} {
    %c0_i32 = arith.constant 0 : i32
    %0 = arith.cmpi eq, %arg2, %c0_i32 : i32
    %1 = arith.extui %0 : i1 to i32
    %c0_i32_0 = arith.constant 0 : i32
    %2 = arith.cmpi ne, %1, %c0_i32_0 : i32
    scf.if %2 {
      %cst_10 = arith.constant 0.000000e+00 : f32
      %12 = vector.broadcast %cst_10 : f32 to vector<16x32xf32>
      %c0_11 = arith.constant 0 : index
      %c0_12 = arith.constant 0 : index
      %13 = vector.load %arg8[%c0_11, %c0_12] : memref<16x32xf32, #tpu.memory_space<vmem>>, vector<16x32xf32>
      tpu.vector_store %arg8[%c0_11, %c0_12], %12 {strides = array<i32>} : memref<16x32xf32, #tpu.memory_space<vmem>>, vector<16x32xf32>,
    } else {
    }
    %c0 = arith.constant 0 : index
    %c0_1 = arith.constant 0 : index
    %3 = vector.load %arg8[%c0, %c0_1] : memref<16x32xf32, #tpu.memory_space<vmem>>, vector<16x32xf32>
    %c0_2 = arith.constant 0 : index
    %c0_3 = arith.constant 0 : index
    %4 = vector.load %arg3[%c0_2, %c0_3] : memref<16x128xbf16, #tpu.memory_space<vmem>>, vector<16x128xbf16>
    %c0_4 = arith.constant 0 : index
    %c0_5 = arith.constant 0 : index
    %5 = vector.load %arg4[%c0_4, %c0_5] : memref<128x32xbf16, #tpu.memory_space<vmem>>, vector<128x32xbf16>
    %cst = arith.constant dense<0.000000e+00> : vector<16x32xf32>
    %6 = tpu.matmul %4, %5, %cst {dimension_numbers = #tpu.dot_dimension_numbers<[1], [0], [0], [1], [0, 0, 1, 1], [], []>} : vector<16x128xbf16>, vector<128x32xbf16>, vector<16x32xf32> -> vector<16x32xf32>
    %7 = arith.addf %3, %6 : vector<16x32xf32>
    %c0_6 = arith.constant 0 : index
    %c0_7 = arith.constant 0 : index
    %8 = vector.load %arg8[%c0_6, %c0_7] : memref<16x32xf32, #tpu.memory_space<vmem>>, vector<16x32xf32>
    tpu.vector_store %arg8[%c0_6, %c0_7], %7 {strides = array<i32>} : memref<16x32xf32, #tpu.memory_space<vmem>>, vector<16x32xf32>,
    %c0_i32_8 = arith.constant 0 : i32
    %9 = arith.cmpi eq, %arg2, %c0_i32_8 : i32
    %10 = arith.extui %9 : i1 to i32
    %c0_i32_9 = arith.constant 0 : i32
    %11 = arith.cmpi ne, %10, %c0_i32_9 : i32
    scf.if %11 {
      %c0_10 = arith.constant 0 : index
      %c0_11 = arith.constant 0 : index
      %12 = vector.load %arg8[%c0_10, %c0_11] : memref<16x32xf32, #tpu.memory_space<vmem>>, vector<16x32xf32>
      %c0_12 = arith.constant 0 : index
      %c0_13 = arith.constant 0 : index
      %13 = vector.load %arg5[%c0_12, %c0_13] : memref<1x32xf32, #tpu.memory_space<vmem>>, vector<1x32xf32>
      %14 = vector.broadcast %13 : vector<1x32xf32> to vector<16x32xf32>
      %15 = arith.addf %12, %14 : vector<16x32xf32>
      %c0_14 = arith.constant 0 : index
      %c0_15 = arith.constant 0 : index
      %16 = vector.load %arg6[%c0_14, %c0_15] : memref<16x32xf32, #tpu.memory_space<vmem>>, vector<16x32xf32>
      %17 = arith.addf %15, %16 : vector<16x32xf32>
      %c0_16 = arith.constant 0 : index
      %c0_17 = arith.constant 0 : index
      %18 = vector.load %arg7[%c0_16, %c0_17] : memref<16x32xf32, #tpu.memory_space<vmem>>, vector<16x32xf32>
      tpu.vector_store %arg7[%c0_16, %c0_17], %17 {strides = array<i32>} : memref<16x32xf32, #tpu.memory_space<vmem>>, vector<16x32xf32>,
    } else {
    }
    return
  }
  func.func @transform_0(%arg0: i32, %arg1: i32, %arg2: i32) -> (i32, i32) {
    %c0_i32 = arith.constant 0 : i32
    return %arg0, %arg2 : i32, i32
  }
  func.func @transform_1(%arg0: i32, %arg1: i32, %arg2: i32) -> (i32, i32) {
    %c0_i32 = arith.constant 0 : i32
    return %arg2, %arg1 : i32, i32
  }
  func.func @transform_2(%arg0: i32, %arg1: i32, %arg2: i32) -> (i32, i32) {
    %c0_i32 = arith.constant 0 : i32
    %c0_i32_0 = arith.constant 0 : i32
    return %c0_i32, %arg1 : i32, i32
  }
  func.func @transform_3(%arg0: i32, %arg1: i32, %arg2: i32) -> (i32, i32) {
    %c0_i32 = arith.constant 0 : i32
    return %arg0, %arg1 : i32, i32
  }
  func.func @transform_4(%arg0: i32, %arg1: i32, %arg2: i32) -> (i32, i32) {
    %c0_i32 = arith.constant 0 : i32
    return %arg0, %arg1 : i32, i32
  }
}

module attributes {stable_mosaic.version = 11 : i64} {
  func.func @kernel(%arg0: i32, %arg1: i32, %arg2: i32, %arg3: memref<16x32xbf16, #tpu.memory_space<vmem>>, %arg4: memref<32x128xbf16, #tpu.memory_space<vmem>>, %arg5: memref<1x128xf32, #tpu.memory_space<vmem>>, %arg6: memref<16x128xbf16, #tpu.memory_space<vmem>>, %arg7: memref<16x128xf32, #tpu.memory_space<vmem>>) attributes {dimension_semantics = [#tpu.dimension_semantics<parallel>, #tpu.dimension_semantics<parallel>, #tpu.dimension_semantics<arbitrary>], iteration_bounds = array<i64: 1, 1, 1>, scalar_prefetch = 0 : i64, scratch_operands = 1 : i64, tpu.core_type = #tpu.core_type<tc>, window_params = [{transform_indices = @transform_0, window_bounds = array<i64: 16, 32>}, {transform_indices = @transform_1, window_bounds = array<i64: 32, 128>}, {transform_indices = @transform_2, window_bounds = array<i64: 1, 128>}, {transform_indices = @transform_3, window_bounds = array<i64: 16, 128>}]} {
    %c0_i32 = arith.constant 0 : i32
    %0 = arith.cmpi eq, %arg2, %c0_i32 : i32
    %1 = arith.extui %0 : i1 to i32
    %c0_i32_0 = arith.constant 0 : i32
    %2 = arith.cmpi ne, %1, %c0_i32_0 : i32
    scf.if %2 {
      %cst_10 = arith.constant 0.000000e+00 : f32
      %12 = vector.broadcast %cst_10 : f32 to vector<16x128xf32>
      %c0_11 = arith.constant 0 : index
      %c0_12 = arith.constant 0 : index
      %13 = vector.load %arg7[%c0_11, %c0_12] : memref<16x128xf32, #tpu.memory_space<vmem>>, vector<16x128xf32>
      tpu.vector_store %arg7[%c0_11, %c0_12], %12 {strides = array<i32>} : memref<16x128xf32, #tpu.memory_space<vmem>>, vector<16x128xf32>,
    } else {
    }
    %c0 = arith.constant 0 : index
    %c0_1 = arith.constant 0 : index
    %3 = vector.load %arg7[%c0, %c0_1] : memref<16x128xf32, #tpu.memory_space<vmem>>, vector<16x128xf32>
    %c0_2 = arith.constant 0 : index
    %c0_3 = arith.constant 0 : index
    %4 = vector.load %arg3[%c0_2, %c0_3] : memref<16x32xbf16, #tpu.memory_space<vmem>>, vector<16x32xbf16>
    %c0_4 = arith.constant 0 : index
    %c0_5 = arith.constant 0 : index
    %5 = vector.load %arg4[%c0_4, %c0_5] : memref<32x128xbf16, #tpu.memory_space<vmem>>, vector<32x128xbf16>
    %cst = arith.constant dense<0.000000e+00> : vector<16x128xf32>
    %6 = tpu.matmul %4, %5, %cst {dimension_numbers = #tpu.dot_dimension_numbers<[1], [0], [0], [1], [0, 0, 1, 1], [], []>} : vector<16x32xbf16>, vector<32x128xbf16>, vector<16x128xf32> -> vector<16x128xf32>
    %7 = arith.addf %3, %6 : vector<16x128xf32>
    %c0_6 = arith.constant 0 : index
    %c0_7 = arith.constant 0 : index
    %8 = vector.load %arg7[%c0_6, %c0_7] : memref<16x128xf32, #tpu.memory_space<vmem>>, vector<16x128xf32>
    tpu.vector_store %arg7[%c0_6, %c0_7], %7 {strides = array<i32>} : memref<16x128xf32, #tpu.memory_space<vmem>>, vector<16x128xf32>,
    %c0_i32_8 = arith.constant 0 : i32
    %9 = arith.cmpi eq, %arg2, %c0_i32_8 : i32
    %10 = arith.extui %9 : i1 to i32
    %c0_i32_9 = arith.constant 0 : i32
    %11 = arith.cmpi ne, %10, %c0_i32_9 : i32
    scf.if %11 {
      %c0_10 = arith.constant 0 : index
      %c0_11 = arith.constant 0 : index
      %12 = vector.load %arg7[%c0_10, %c0_11] : memref<16x128xf32, #tpu.memory_space<vmem>>, vector<16x128xf32>
      %c0_12 = arith.constant 0 : index
      %c0_13 = arith.constant 0 : index
      %13 = vector.load %arg5[%c0_12, %c0_13] : memref<1x128xf32, #tpu.memory_space<vmem>>, vector<1x128xf32>
      %14 = vector.broadcast %13 : vector<1x128xf32> to vector<16x128xf32>
      %15 = arith.addf %12, %14 : vector<16x128xf32>
      %cst_14 = arith.constant 5.000000e-01 : f32
      %16 = vector.broadcast %cst_14 : f32 to vector<16x128xf32>
      %17 = arith.mulf %16, %15 : vector<16x128xf32>
      %cst_15 = arith.constant 0.707106769 : f32
      %18 = vector.broadcast %cst_15 : f32 to vector<16x128xf32>
      %19 = arith.mulf %15, %18 : vector<16x128xf32>
      %20 = math.absf %19 : vector<16x128xf32>
      %cst_16 = arith.constant 0.327591091 : f32
      %21 = vector.broadcast %cst_16 : f32 to vector<16x128xf32>
      %22 = arith.mulf %21, %20 : vector<16x128xf32>
      %cst_17 = arith.constant 1.000000e+00 : f32
      %23 = vector.broadcast %cst_17 : f32 to vector<16x128xf32>
      %24 = arith.addf %23, %22 : vector<16x128xf32>
      %cst_18 = arith.constant 1.000000e+00 : f32
      %25 = vector.broadcast %cst_18 : f32 to vector<16x128xf32>
      %26 = arith.divf %25, %24 : vector<16x128xf32>
      %cst_19 = arith.constant 1.06140542 : f32
      %27 = vector.broadcast %cst_19 : f32 to vector<16x128xf32>
      %28 = arith.mulf %27, %26 : vector<16x128xf32>
      %cst_20 = arith.constant -1.45315206 : f32
      %29 = vector.broadcast %cst_20 : f32 to vector<16x128xf32>
      %30 = arith.addf %28, %29 : vector<16x128xf32>
      %31 = arith.mulf %30, %26 : vector<16x128xf32>
      %cst_21 = arith.constant 1.42141378 : f32
      %32 = vector.broadcast %cst_21 : f32 to vector<16x128xf32>
      %33 = arith.addf %31, %32 : vector<16x128xf32>
      %34 = arith.mulf %33, %26 : vector<16x128xf32>
      %cst_22 = arith.constant -0.284496725 : f32
      %35 = vector.broadcast %cst_22 : f32 to vector<16x128xf32>
      %36 = arith.addf %34, %35 : vector<16x128xf32>
      %37 = arith.mulf %36, %26 : vector<16x128xf32>
      %cst_23 = arith.constant 0.254829586 : f32
      %38 = vector.broadcast %cst_23 : f32 to vector<16x128xf32>
      %39 = arith.addf %37, %38 : vector<16x128xf32>
      %40 = arith.mulf %39, %26 : vector<16x128xf32>
      %cst_24 = arith.constant 0.000000e+00 : f32
      %41 = vector.broadcast %cst_24 : f32 to vector<16x128xf32>
      %42 = arith.subf %41, %20 : vector<16x128xf32>
      %43 = arith.mulf %42, %20 : vector<16x128xf32>
      %44 = math.exp %43 : vector<16x128xf32>
      %45 = arith.mulf %40, %44 : vector<16x128xf32>
      %cst_25 = arith.constant 1.000000e+00 : f32
      %46 = vector.broadcast %cst_25 : f32 to vector<16x128xf32>
      %47 = arith.subf %46, %45 : vector<16x128xf32>
      %cst_26 = arith.constant 0.000000e+00 : f32
      %48 = vector.broadcast %cst_26 : f32 to vector<16x128xf32>
      %49 = arith.cmpf olt, %19, %48 : vector<16x128xf32>
      %cst_27 = arith.constant 0.000000e+00 : f32
      %50 = vector.broadcast %cst_27 : f32 to vector<16x128xf32>
      %51 = arith.subf %50, %47 : vector<16x128xf32>
      %52 = arith.select %49, %51, %47 : vector<16x128xi1>, vector<16x128xf32>
      %cst_28 = arith.constant 1.000000e+00 : f32
      %53 = vector.broadcast %cst_28 : f32 to vector<16x128xf32>
      %54 = arith.addf %53, %52 : vector<16x128xf32>
      %55 = arith.mulf %17, %54 : vector<16x128xf32>
      %56 = arith.truncf %55 : vector<16x128xf32> to vector<16x128xbf16>
      %c0_29 = arith.constant 0 : index
      %c0_30 = arith.constant 0 : index
      %57 = vector.load %arg6[%c0_29, %c0_30] : memref<16x128xbf16, #tpu.memory_space<vmem>>, vector<16x128xbf16>
      tpu.vector_store %arg6[%c0_29, %c0_30], %56 {strides = array<i32>} : memref<16x128xbf16, #tpu.memory_space<vmem>>, vector<16x128xbf16>,
    } else {
    }
    return
  }
  func.func @transform_0(%arg0: i32, %arg1: i32, %arg2: i32) -> (i32, i32) {
    %c0_i32 = arith.constant 0 : i32
    return %arg0, %arg2 : i32, i32
  }
  func.func @transform_1(%arg0: i32, %arg1: i32, %arg2: i32) -> (i32, i32) {
    %c0_i32 = arith.constant 0 : i32
    return %arg2, %arg1 : i32, i32
  }
  func.func @transform_2(%arg0: i32, %arg1: i32, %arg2: i32) -> (i32, i32) {
    %c0_i32 = arith.constant 0 : i32
    %c0_i32_0 = arith.constant 0 : i32
    return %c0_i32, %arg1 : i32, i32
  }
  func.func @transform_3(%arg0: i32, %arg1: i32, %arg2: i32) -> (i32, i32) {
    %c0_i32 = arith.constant 0 : i32
    return %arg0, %arg1 : i32, i32
  }
}

</mosaic_0001>

<bundles_post_ra>
// kernel: block_forward.7
= control target key start
LH: loop header
LB: loop body
LE: loop exit
PB: predicated region body
PF: predicated region fallthrough
CT: control target
= control target key end

     0   :  { %vm20_vm0 = vcmask 261120   ;;  %vm104_vm1 = vcmask 257024   ;;  %s188_s0 = inlined_call_operand.vmem [shape: f32[16,32], index: 0, kind: input, shape index: {}]   ;;  %s189_s1 = inlined_call_operand.vmem [shape: f32[1,32], index: 1, kind: input, shape index: {}]   ;;  %s190_s2 = inlined_call_operand.vmem [shape: f32[1,32], index: 2, kind: input, shape index: {}]   ;;  %s191_s3 = inlined_call_operand.vmem [shape: f32[16,32], index: 3, kind: output, shape index: {0}]   ;;  %s192_s4 = inlined_call_operand.vmem [shape: bf16[16,32], index: 4, kind: output, shape index: {1}]  }
   0x1   :  { %v16_v0 = vld [vmem:[%s188_s0] sm:$0xff]  ;;  %v17_v1 = vld [vmem:[%s188_s0 + $0x8] sm:$0xff] }
   0x2   :  { %v21_v2 = vsel %vm20_vm0, %v16_v0, 0.0  ;;  %v24_v3 = vsel %vm20_vm0, %v17_v1, 0.0  ;;  %v115_v21 = vld [vmem:[%s189_s1] ss:$0 sm:$0xff] }
   0x3   :  { %22 = vadd.xlane.f32.xlu0 %v21_v2  ;;  %v116_v23 = vld [vmem:[%s190_s2] ss:$0 sm:$0xff] }
   0x7   :  { %25 = vadd.xlane.f32.xlu0 %v24_v3 }
  0x8c   :  { %v23_v4 = vpop.xlane.xlu0 %22 }
  0x8d   :  { %v28_v5 = vmul.f32 0.03125, %v23_v4 }
  0x8f   :  { %v30_v6 = vsub.f32 %v16_v0, %v28_v5 }
  0x90   :  { %v26_v7 = vpop.xlane.xlu0 %25 }
  0x91   :  { %v29_v8 = vmul.f32 0.03125, %v26_v7  ;;  %v32_v9 = vmul.f32 %v30_v6, %v30_v6 }
  0x93   :  { %v31_v10 = vsub.f32 %v17_v1, %v29_v8  ;;  %v34_v11 = vsel %vm20_vm0, %v32_v9, 0.0 }
  0x94   :  { %35 = vadd.xlane.f32.xlu1 %v34_v11 }
  0x95   :  { %v33_v12 = vmul.f32 %v31_v10, %v31_v10 }
  0x97   :  { %v37_v13 = vsel %vm20_vm0, %v33_v12, 0.0 }
  0x98   :  { %38 = vadd.xlane.f32.xlu1 %v37_v13 }
 0x11d   :  { %v36_v14 = vpop.xlane.xlu1 %35 }
 0x11e   :  { %v40_v15 = vmul.f32 0.03125, %v36_v14 }
 0x120   :  { %v42_v16 = vadd.f32 1e-05, %v40_v15 }
 0x121   :  { %v39_v17 = vpop.xlane.xlu1 %38 }
 0x122   :  { %121 = vrsqrt.f32 %v42_v16  ;;  %v41_v18 = vmul.f32 0.03125, %v39_v17 }
 0x124   :  { %v43_v19 = vadd.f32 1e-05, %v41_v18 }
 0x126   :  { %123 = vrsqrt.f32 %v43_v19 }
 0x12f   :  { %v122_v20 = vpop.eup %121 }
 0x130   :  { %v46_v22 = vmul.f32 %v122_v20, %v30_v6 }
 0x132   :  { %v54_v24 = vmul.f32 %v115_v21, %v46_v22 }
 0x133   :  { %v124_v25 = vpop.eup %123 }
 0x134   :  { %v62_v26 = vadd.f32 %v116_v23, %v54_v24  ;;  %v47_v27 = vmul.f32 %v124_v25, %v31_v10 }
 0x136   :  { %v64_v28 = vsel %vm20_vm0, %v62_v26, 0.0  ;;  %94 = vst.msk [vmem:[%s191_s3] sm:$0xff] %vm20_vm0, %v62_v26  ;;  %v55_v29 = vmul.f32 %v115_v21, %v47_v27 }
 0x137   :  { %65 = vadd.xlane.f32.xlu0 %v64_v28 }
 0x138   :  { %v63_v30 = vadd.f32 %v116_v23, %v55_v29 }
 0x13a   :  { %v67_v31 = vsel %vm20_vm0, %v63_v30, 0.0  ;;  %95 = vst.msk [vmem:[%s191_s3 + $0x8] sm:$0xff] %vm20_vm0, %v63_v30 }
 0x13b   :  { %68 = vadd.xlane.f32.xlu1 %v67_v31 }
 0x1c0   :  { %v66_v32 = vpop.xlane.xlu0 %65 }
 0x1c1   :  { %v70_v33 = vmul.f32 0.03125, %v66_v32 }
 0x1c3   :  { %v72_v34 = vsub.f32 %v62_v26, %v70_v33 }
 0x1c4   :  { %v69_v35 = vpop.xlane.xlu1 %68 }
 0x1c5   :  { %v71_v36 = vmul.f32 0.03125, %v69_v35  ;;  %v74_v37 = vmul.f32 %v72_v34, %v72_v34 }
 0x1c7   :  { %v73_v38 = vsub.f32 %v63_v30, %v71_v36  ;;  %v76_v39 = vsel %vm20_vm0, %v74_v37, 0.0 }
 0x1c8   :  { %77 = vadd.xlane.f32.xlu0 %v76_v39 }
 0x1c9   :  { %v75_v40 = vmul.f32 %v73_v38, %v73_v38 }
 0x1cb   :  { %v79_v41 = vsel %vm20_vm0, %v75_v40, 0.0 }
 0x1cc   :  { %80 = vadd.xlane.f32.xlu1 %v79_v41 }
 0x251   :  { %v78_v42 = vpop.xlane.xlu0 %77 }
 0x252   :  { %v82_v43 = vmul.f32 0.03125, %v78_v42 }
 0x254   :  { %v84_v44 = vadd.f32 1e-05, %v82_v43 }
 0x255   :  { %v81_v45 = vpop.xlane.xlu1 %80 }
 0x256   :  { %125 = vrsqrt.f32 %v84_v44  ;;  %v83_v46 = vmul.f32 0.03125, %v81_v45 }
 0x258   :  { %v85_v47 = vadd.f32 1e-05, %v83_v46 }
 0x25a   :  { %127 = vrsqrt.f32 %v85_v47 }
 0x263   :  { %v126_v48 = vpop.eup %125 }
 0x264   :  { %v88_v49 = vmul.f32 %v126_v48, %v72_v34 }
 0x266   :  { %v90_v50 = vmul.f32 %v115_v21, %v88_v49 }
 0x267   :  { %v128_v51 = vpop.eup %127 }
 0x268   :  { %v92_v52 = vadd.f32 %v116_v23, %v90_v50  ;;  %v89_v53 = vmul.f32 %v128_v51, %v73_v38 }
 0x26a   :  { %v119_v54 = vpack.c.bf16 %v92_v52, %v92_v52  ;;  %v91_v55 = vmul.f32 %v115_v21, %v89_v53 }
 0x26c   :  { %105 = vst.msk [vmem:[%s192_s4] sm:$0xf] %vm104_vm1, %v119_v54  ;;  %v93_v56 = vadd.f32 %v116_v23, %v91_v55 }
 0x26e   :  { %v120_v57 = vpack.c.bf16 %v93_v56, %v93_v56 }
 0x270   :  { %106 = vst.msk [vmem:[%s192_s4 + $0x4] sm:$0xf] %vm104_vm1, %v120_v57 }

// kernel: block_forward.8
= control target key start
LH: loop header
LB: loop body
LE: loop exit
PB: predicated region body
PF: predicated region fallthrough
CT: control target
= control target key end

     0   :  { %vm19_vm0 = vcmask 785408   ;;  %v151_v0 = vmov 0.0   ;;  %vm152_vm1 = vmmov 0   ;;  %vm47_vm2 = vcmask 261120   ;;  %s195_s1 = inlined_call_operand.vmem [shape: bf16[32,96], index: 1, kind: input, shape index: {}]   ;;  %s196_s0 = inlined_call_operand.vmem [shape: bf16[16,32], index: 0, kind: input, shape index: {}]   ;;  %s197_s2 = inlined_call_operand.vmem [shape: f32[1,96], index: 2, kind: input, shape index: {}]   ;;  %s198_s3 = inlined_call_operand.vmem [shape: bf16[16,96], index: 3, kind: output, shape index: {}]  }
   0x1   :  { %138 = vmatprep.subr.bf16.mxu0 %v151_v0  ;;  %v148_v1 = vld [vmem:[%s195_s1 + $0x8] sm:$0xff]   ;;  %142 = vmatprep.mubr.msk.bf16.mxu0 %vm152_vm1, %v151_v0  ;;  %20 = vst.msk [vmem:[#allocation2] sm:$0xff] %vm19_vm0, %v151_v0  ;;  %21 = vst.msk [vmem:[#allocation2 + $0x8] sm:$0xff] %vm19_vm0, %v151_v0  ;;  %v149_v2 = vld [vmem:[%s195_s1] sm:$0xff]   ;;  %vm119_vm3 = vcmask 781312  }
   0x2   :  { %139 = vmatpush3.bf16.msra.mxu0 %v148_v1  ;;  %v150_v3 = vld [vmem:[%s196_s0] sm:$0xff]  }
   0x3   :  { %140 = vmatprep.subr.bf16.mxu0 %v151_v0  ;;  %v130_v12 = vld [vmem:[%s197_s2] ss:$0 sm:$0xff] }
   0x6   :  { %141 = vmatpush3.bf16.msra.mxu0 %v149_v2 }
   0x8   :  { %v22_v4 = vld [vmem:[#allocation2] sm:$0xff]  ;;  %v23_v8 = vld [vmem:[#allocation2 + $0x8] sm:$0xff] }
   0x9   :  { %143 = vmatmul.mubr.msk.bf16.vlgmr.msra.gmra.mxu0 %vm47_vm2, %v150_v3 }
  0xc9   :  { %v85_v5 = vpop.f32.mrf.mxu0 }
  0xca   :  { %v92_v6 = vadd.f32 %v85_v5, %v22_v4 }
  0xcb   :  { %v144_v7 = vpop.f32.mrf.mxu0 }
  0xcc   :  { %95 = vst.msk [vmem:[#allocation2] sm:$0xff] %vm19_vm0, %v92_v6 }
  0xcd   :  { %v88_v9 = vpop.f32.mrf.mxu0 }
  0xce   :  { %v93_v10 = vadd.f32 %v88_v9, %v23_v8 }
  0xcf   :  { %v145_v11 = vpop.f32.mrf.mxu0 }
  0xd0   :  { %96 = vst.msk [vmem:[#allocation2 + $0x8] sm:$0xff] %vm19_vm0, %v93_v10 }
  0xd3   :  { %v100_v13 = vld [vmem:[#allocation2] sm:$0xff] }
  0xd4   :  { %v109_v14 = vadd.f32 %v130_v12, %v100_v13 }
  0xd6   :  { %v133_v15 = vpack.c.bf16 %v109_v14, %v109_v14 }
  0xd7   :  { %v101_v16 = vld [vmem:[#allocation2 + $0x8] sm:$0xff] }
  0xd8   :  { %120 = vst.msk [vmem:[%s198_s3] sm:$0xf] %vm119_vm3, %v133_v15  ;;  %v110_v17 = vadd.f32 %v130_v12, %v101_v16 }
  0xda   :  { %v134_v18 = vpack.c.bf16 %v110_v17, %v110_v17 }
  0xdc   :  { %121 = vst.msk [vmem:[%s198_s3 + $0x4] sm:$0xf] %vm119_vm3, %v134_v18 }

// kernel: block_forward.10
= control target key start
LH: loop header
LB: loop body
LE: loop exit
PB: predicated region body
PF: predicated region fallthrough
CT: control target
= control target key end

     0   :  { %vm22_vm0 = vcmask 261120   ;;  %v144_v0 = vmov 0.0   ;;  %vm145_vm1 = vmmov 0   ;;  %s202_s1 = inlined_call_operand.vmem [shape: bf16[32,32], index: 1, kind: input, shape index: {}]   ;;  %s203_s0 = inlined_call_operand.vmem [shape: bf16[16,32], index: 0, kind: input, shape index: {}]   ;;  %s204_s2 = inlined_call_operand.vmem [shape: f32[1,32], index: 2, kind: input, shape index: {}]   ;;  %s205_s3 = inlined_call_operand.vmem [shape: f32[16,32], index: 3, kind: input, shape index: {}]   ;;  %s206_s4 = inlined_call_operand.vmem [shape: f32[16,32], index: 4, kind: output, shape index: {}]  }
   0x1   :  { %131 = vmatprep.subr.bf16.mxu0 %v144_v0  ;;  %v141_v1 = vld [vmem:[%s202_s1 + $0x8] sm:$0xff]   ;;  %135 = vmatprep.mubr.msk.bf16.mxu0 %vm145_vm1, %v144_v0  ;;  %23 = vst.msk [vmem:[#allocation2] sm:$0xff] %vm22_vm0, %v144_v0  ;;  %24 = vst.msk [vmem:[#allocation2 + $0x8] sm:$0xff] %vm22_vm0, %v144_v0  ;;  %v142_v2 = vld [vmem:[%s202_s1] sm:$0xff]  }
   0x2   :  { %132 = vmatpush3.bf16.msra.mxu0 %v141_v1  ;;  %v143_v3 = vld [vmem:[%s203_s0] sm:$0xff]   ;;  %v114_v18 = vld [vmem:[%s205_s3 + $0x8] sm:$0xff] }
   0x3   :  { %133 = vmatprep.subr.bf16.mxu0 %v144_v0  ;;  %v127_v12 = vld [vmem:[%s204_s2] ss:$0 sm:$0xff] }
   0x4   :  { %v113_v14 = vld [vmem:[%s205_s3] sm:$0xff] }
   0x6   :  { %134 = vmatpush3.bf16.msra.mxu0 %v142_v2 }
   0x8   :  { %v25_v4 = vld [vmem:[#allocation2] sm:$0xff]  ;;  %v26_v8 = vld [vmem:[#allocation2 + $0x8] sm:$0xff] }
   0x9   :  { %136 = vmatmul.mubr.msk.bf16.vlgmr.msra.gmra.mxu0 %vm22_vm0, %v143_v3 }
  0xc9   :  { %v88_v5 = vpop.f32.mrf.mxu0 }
  0xca   :  { %v95_v6 = vadd.f32 %v88_v5, %v25_v4 }
  0xcb   :  { %v137_v7 = vpop.f32.mrf.mxu0 }
  0xcc   :  { %97 = vst.msk [vmem:[#allocation2] sm:$0xff] %vm22_vm0, %v95_v6 }
  0xcd   :  { %v91_v9 = vpop.f32.mrf.mxu0 }
  0xce   :  { %v96_v10 = vadd.f32 %v91_v9, %v26_v8 }
  0xcf   :  { %v138_v11 = vpop.f32.mrf.mxu0 }
  0xd0   :  { %98 = vst.msk [vmem:[#allocation2 + $0x8] sm:$0xff] %vm22_vm0, %v96_v10 }
  0xd3   :  { %v102_v13 = vld [vmem:[#allocation2] sm:$0xff] }
  0xd4   :  { %v111_v15 = vadd.f32 %v127_v12, %v102_v13 }
  0xd6   :  { %v115_v16 = vadd.f32 %v113_v14, %v111_v15 }
  0xd7   :  { %v103_v17 = vld [vmem:[#allocation2 + $0x8] sm:$0xff] }
  0xd8   :  { %117 = vst.msk [vmem:[%s206_s4] sm:$0xff] %vm22_vm0, %v115_v16  ;;  %v112_v19 = vadd.f32 %v127_v12, %v103_v17 }
  0xda   :  { %v116_v20 = vadd.f32 %v114_v18, %v112_v19 }
  0xdc   :  { %118 = vst.msk [vmem:[%s206_s4 + $0x8] sm:$0xff] %vm22_vm0, %v116_v20 }

// kernel: block_forward.9
= control target key start
LH: loop header
LB: loop body
LE: loop exit
PB: predicated region body
PF: predicated region fallthrough
CT: control target
= control target key end

     0   :  { %s807_s6 = smov 0   ;;  %s898_s0 = inlined_call_operand.vmem [shape: bf16[2,8,96], index: 0, kind: input, shape index: {}]   ;;  %s899_s1 = inlined_call_operand.vmem [shape: bf16[2,8,32], index: 1, kind: output, shape index: {}]  }
   0x1 LB: > { %s644_s7 = sadd.s32 4294967295, %s779_s6   ;;  %p648_p0 = scmp.ge.s32.totalorder %s779_s6, 1  ;;  %s779_s6 = sphi %s807_s6, %s11_s6  }
   0x2   : > { %p86_p1 = scmp.lt.s32.totalorder %s779_s6, 3 }
   0x4   : > { %p87_p2 = pnand %p648_p0, %p86_p1 }
   0x5   : > { %p104_p3 = scmp.lt.s32.totalorder (!%p87_p2), %s644_s7, 1  ;;  %s783_s12 = smov (!%p87_p2), 96  }
   0x6   : > { %90 = sbr.rel (%p87_p2) target bundleno = 1538 (0x602), region = 24  ;;  %s784_s13 = smov (!%p87_p2), 64  }
   0x7   : > { %s785_s14 = smov (!%p87_p2), 88   ;;  %s786_s15 = smov (!%p87_p2), 72  }
   0x8   : > { %s787_s16 = smov (!%p87_p2), 120   ;;  %s788_s17 = smov (!%p87_p2), 80  }
   0x9   : > { %s789_s18 = smov (!%p87_p2), 112   ;;  %s790_s19 = smov (!%p87_p2), 104  }
   0xa   : > { %s791_s23 = smov (!%p87_p2), 56   ;;  %s792_s24 = smov (!%p87_p2), 48  }
   0xb   : > { %v781_v0 = vmov 0.0   ;;  %vm782_vm0 = vmmov 0   ;;  %s901_s7 = smov (!%p104_p3, %s644_s7), 1  ;;  %vm119_vm1 = vcmask 64512   ;;  %vm184_vm2 = vcmask 1043456   ;;  %s793_s25 = smov 40  }
   0xc   : > { %684 = vmatprep.subr.bf16.mxu0 %v781_v0  ;;  %686 = vmatprep.mubr.msk.bf16.mxu0 %vm782_vm0, %v781_v0  ;;  %s649_s8 = sshll.u32 %s901_s7, 2  ;;  %vm229_vm3 = vcmask 60416   ;;  %s794_s26 = smov 8   ;;  %vm349_vm4 = vcmask 126016   ;;  %vm469_vm5 = vcmask 191616   ;;  %vm589_vm6 = vcmask 257216  }
   0xd   : > { %690 = vmatprep.subr.bf16.mxu1 %v781_v0  ;;  %692 = vmatprep.mubr.msk.bf16.mxu1 %vm782_vm0, %v781_v0  ;;  %s107_s11 = scalar_lea.vmem %s898_s0, %s649_s8  ;;  %s868_s22 = scalar_lea.vmem %s899_s1, %s649_s8 }
   0xe   : > { %v113_v1 = vld [vmem:[%s107_s11] sm:$0xf]  ;;  %s795_s27 = smov 16   ;;  %s796_s28 = smov 24  }
   0xf   : > { %v829_v2 = vcombine.low %v113_v1, %v113_v1 }
  0x11   : > { %117 = vrot.lane.b32.xlu0 %v829_v2, %s783_s12  ;;  %179 = vrot.lane.b32.xlu1 %v829_v2, %s784_s13 }
  0x15   : > { %233 = vrot.lane.b32.xlu1 %v829_v2, %s785_s14 }
  0x83   : > { %v118_v3 = vpop.permute.xlu0 %117  ;;  %v180_v11 = vpop.permute.xlu1 %179 }
  0x84   : > { %v124_v4 = vsel %vm119_vm1, %v118_v3, 0  ;;  %v186_v12 = vsel %vm184_vm2, %v180_v11, 0 }
  0x85   : > { %685 = vmatpush3.bf16.xpose.msra.mxu0 %v124_v4  ;;  %691 = vmatpush3.bf16.msra.mxu1 %v186_v12 }
  0x86   : > { %702 = vmatprep.subr.bf16.mxu0 %v781_v0  ;;  %696 = vmatprep.subr.bf16.mxu1 %v781_v0 }
  0x87   : > { %v234_v18 = vpop.permute.xlu1 %233 }
  0x88   : > { %v239_v24 = vsel %vm119_vm1, %v234_v18, 0 }
  0x8c   : > { %687 = vmatmul.mubr.msk.bf16.vlgmr.msra.gmra.mxu0 %vm119_vm1, %v113_v1 }
  0x8d   : > { %704 = vmatprep.mubr.msk.bf16.mxu0 %vm782_vm0, %v781_v0 }
 0x14c   : > { %v160_v5 = vpop.f32.mrf.mxu0 }
 0x14d   : > { %v166_v6 = vmul.f32 0.35355338, %v160_v5 }
 0x14e   : > { %v688_v7 = vpop.f32.mrf.mxu0 }
 0x14f   : > { %v167_v8 = vsel %vm119_vm1, %v166_v6, -inf }
 0x150   : > { %168 = vmax.xlane.f32.xlu0 %v167_v8  ;;  %v163_v9 = vpop.f32.mrf.mxu0 }
 0x152   : > { %v689_v10 = vpop.f32.mrf.mxu0 }
 0x166   : > { %473 = vrot.lane.b32.xlu0 %v829_v2, %s786_s15 }
 0x1d9   : > { %v169_v13 = vpop.xlane.xlu0 %168 }
 0x1da   : > { %v170_v14 = vsub.f32 %v166_v6, %v169_v13 }
 0x1dc   : > { %v171_v15 = vmul.f32 1.442695, %v170_v14 }
 0x1dd   : > { %v474_v27 = vpop.permute.xlu0 %473 }
 0x1de   : > { %757 = vpow2.f32 %v171_v15  ;;  %v479_v29 = vsel %vm119_vm1, %v474_v27, 0 }
 0x1eb   : > { %v758_v16 = vpop.eup %757 }
 0x1ec   : > { %v173_v17 = vsel %vm119_vm1, %v758_v16, 0.0 }
 0x1ed   : > { %174 = vadd.xlane.f32.xlu1 %v173_v17 }
 0x1fe   : > { %231 = vrot.lane.b32.xlu1 %v829_v2, %s787_s16 }
 0x202   : > { %353 = vrot.lane.b32.xlu1 %v829_v2, %s788_s17 }
 0x206   : > { %351 = vrot.lane.b32.xlu1 %v829_v2, %s789_s18 }
 0x20a   : > { %471 = vrot.lane.b32.xlu1 %v829_v2, %s790_s19 }
 0x276   : > { %v175_v19 = vpop.xlane.xlu1 %174 }
 0x277   : > { %759 = vrcp.f32 %v175_v19 }
 0x27a   : > { %v232_v22 = vpop.permute.xlu1 %231 }
 0x27e   : > { %v354_v25 = vpop.permute.xlu1 %353 }
 0x27f   : > { %v359_v26 = vsel %vm119_vm1, %v354_v25, 0 }
 0x282   : > { %v352_v28 = vpop.permute.xlu1 %351 }
 0x284   : > { %v760_v20 = vpop.eup %759 }
 0x285   : > { %v177_v21 = vmul.f32 %v760_v20, %v758_v16 }
 0x286   : > { %v472_v30 = vpop.permute.xlu1 %471 }
 0x287   : > { %v178_v23 = vpack.c.bf16 %v177_v21, %v177_v21 }
 0x289   : > { %693 = vmatmul.mubr.msk.bf16.vlgmr.msra.gmra.mxu1 %vm119_vm1, %v178_v23 }
 0x28a   : > { %697 = vmatpush3.bf16.xpose.msra.mxu1 %v239_v24  ;;  %698 = vmatprep.mubr.msk.bf16.mxu1 %vm782_vm0, %v781_v0 }
 0x28b   : > { %708 = vmatprep.subr.bf16.mxu1 %v781_v0 }
 0x291   : > { %699 = vmatmul.mubr.msk.bf16.vlgmr.msra.gmra.mxu1 %vm119_vm1, %v232_v22 }
 0x292   : > { %709 = vmatpush3.bf16.xpose.msra.mxu1 %v359_v26  ;;  %710 = vmatprep.mubr.msk.bf16.mxu1 %vm782_vm0, %v781_v0 }
 0x293   : > { %720 = vmatprep.subr.bf16.mxu1 %v781_v0 }
 0x299   : > { %711 = vmatmul.mubr.msk.bf16.vlgmr.msra.gmra.mxu1 %vm119_vm1, %v352_v28 }
 0x29a   : > { %721 = vmatpush3.bf16.xpose.msra.mxu1 %v479_v29  ;;  %722 = vmatprep.mubr.msk.bf16.mxu1 %vm782_vm0, %v781_v0 }
 0x2a1   : > { %723 = vmatmul.mubr.msk.bf16.vlgmr.msra.gmra.mxu1 %vm119_vm1, %v472_v30 }
 0x349   : > { %v222_v31 = vpop.f32.mrf.mxu1 }
 0x34a   : > { %v228_v32 = vpack.c.bf16 %v222_v31, %v222_v31 }
 0x34b   : > { %v694_v33 = vpop.f32.mrf.mxu1 }
 0x34c   : > { %230 = vst.msk [vmem:[%s868_s22] sm:$0xf] %vm229_vm3, %v228_v32 }
 0x34d   : > { %v225_v34 = vpop.f32.mrf.mxu1 }
 0x34f   : > { %v695_v35 = vpop.f32.mrf.mxu1 }
 0x351   : > { %v275_v36 = vpop.f32.mrf.mxu1 }
 0x352   : > { %v281_v37 = vmul.f32 0.35355338, %v275_v36 }
 0x353   : > { %v700_v38 = vpop.f32.mrf.mxu1 }
 0x354   : > { %v282_v39 = vsel %vm119_vm1, %v281_v37, -inf }
 0x355   : > { %283 = vmax.xlane.f32.xlu1 %v282_v39  ;;  %v278_v40 = vpop.f32.mrf.mxu1 }
 0x357   : > { %v701_v41 = vpop.f32.mrf.mxu1 }
 0x359   : > { %v395_v42 = vpop.f32.mrf.mxu1 }
 0x35a   : > { %v401_v43 = vmul.f32 0.35355338, %v395_v42 }
 0x35b   : > { %v712_v44 = vpop.f32.mrf.mxu1 }
 0x35c   : > { %v402_v45 = vsel %vm119_vm1, %v401_v43, -inf }
 0x35d   : > { %403 = vmax.xlane.f32.xlu0 %v402_v45  ;;  %v398_v46 = vpop.f32.mrf.mxu1 }
 0x35f   : > { %v713_v47 = vpop.f32.mrf.mxu1 }
 0x361   : > { %v515_v48 = vpop.f32.mrf.mxu1 }
 0x362   : > { %v521_v49 = vmul.f32 0.35355338, %v515_v48 }
 0x363   : > { %v724_v50 = vpop.f32.mrf.mxu1 }
 0x364   : > { %v522_v51 = vsel %vm119_vm1, %v521_v49, -inf }
 0x365   : > { %523 = vmax.xlane.f32.xlu1 %v522_v51  ;;  %v518_v52 = vpop.f32.mrf.mxu1 }
 0x367   : > { %v725_v53 = vpop.f32.mrf.mxu1 }
 0x3de   : > { %v284_v54 = vpop.xlane.xlu1 %283 }
 0x3df   : > { %v285_v55 = vsub.f32 %v281_v37, %v284_v54 }
 0x3e1   : > { %v286_v56 = vmul.f32 1.442695, %v285_v55 }
 0x3e3   : > { %761 = vpow2.f32 %v286_v56 }
 0x3e6   : > { %v404_v1 = vpop.xlane.xlu0 %403 }
 0x3e7   : > { %v405_v3 = vsub.f32 %v401_v43, %v404_v1 }
 0x3e9   : > { %v406_v4 = vmul.f32 1.442695, %v405_v3 }
 0x3ee   : > { %v524_v57 = vpop.xlane.xlu1 %523 }
 0x3ef   : > { %v525_v58 = vsub.f32 %v521_v49, %v524_v57 }
 0x3f0   : > { %v762_v59 = vpop.eup %761 }
 0x3f1   : > { %v526_v60 = vmul.f32 1.442695, %v525_v58  ;;  %v288_v61 = vsel %vm119_vm1, %v762_v59, 0.0 }
 0x3f2   : > { %289 = vadd.xlane.f32.xlu1 %v288_v61 }
 0x3f3   : > { %763 = vpow2.f32 %v526_v60 }
 0x3f4   : > { %765 = vpow2.f32 %v406_v4 }
 0x400   : > { %v764_v62 = vpop.eup %763 }
 0x401   : > { %v528_v63 = vsel %vm119_vm1, %v764_v62, 0.0  ;;  %v766_v5 = vpop.eup %765 }
 0x402   : > { %529 = vadd.xlane.f32.xlu0 %v528_v63  ;;  %v408_v6 = vsel %vm119_vm1, %v766_v5, 0.0 }
 0x403   : > { %294 = vrot.lane.b32.xlu1 %v829_v2, %s791_s23 }
 0x418   : > { %414 = vrot.lane.b32.xlu0 %v829_v2, %s792_s24 }
 0x427   : > { %409 = vadd.xlane.f32.xlu1 %v408_v6 }
 0x438   : > { %534 = vrot.lane.b32.xlu1 %v829_v2, %s793_s25 }
 0x47b   : > { %v290_v7 = vpop.xlane.xlu1 %289 }
 0x47c   : > { %767 = vrcp.f32 %v290_v7 }
 0x47f   : > { %v295_v8 = vpop.permute.xlu1 %294 }
 0x480   : > { %v300_v9 = vsel %vm184_vm2, %v295_v8, 0 }
 0x481   : > { %703 = vmatpush3.bf16.msra.mxu0 %v300_v9 }
 0x482   : > { %714 = vmatprep.subr.bf16.mxu0 %v781_v0 }
 0x489   : > { %v768_v10 = vpop.eup %767 }
 0x48a   : > { %v292_v11 = vmul.f32 %v768_v10, %v762_v59 }
 0x48b   : > { %v530_v12 = vpop.xlane.xlu0 %529 }
 0x48c   : > { %v293_v13 = vpack.c.bf16 %v292_v11, %v292_v11 }
 0x48e   : > { %705 = vmatmul.mubr.msk.bf16.vlgmr.msra.gmra.mxu0 %vm119_vm1, %v293_v13 }
 0x48f   : > { %v415_v14 = vpop.permute.xlu0 %414  ;;  %716 = vmatprep.mubr.msk.bf16.mxu0 %vm782_vm0, %v781_v0 }
 0x490   : > { %v420_v2 = vsel %vm184_vm2, %v415_v14, 0 }
 0x491   : > { %715 = vmatpush3.bf16.msra.mxu0 %v420_v2 }
 0x492   : > { %726 = vmatprep.subr.bf16.mxu0 %v781_v0 }
 0x4b0   : > { %v410_v15 = vpop.xlane.xlu1 %409 }
 0x4b1   : > { %769 = vrcp.f32 %v410_v15 }
 0x4b2   : > { %771 = vrcp.f32 %v530_v12 }
 0x4b4   : > { %v535_v17 = vpop.permute.xlu1 %534 }
 0x4b5   : > { %v540_v19 = vsel %vm184_vm2, %v535_v17, 0 }
 0x4be   : > { %v770_v16 = vpop.eup %769 }
 0x4bf   : > { %v412_v18 = vmul.f32 %v770_v16, %v766_v5  ;;  %v772_v21 = vpop.eup %771 }
 0x4c0   : > { %v532_v22 = vmul.f32 %v772_v21, %v764_v62 }
 0x4c1   : > { %v413_v20 = vpack.c.bf16 %v412_v18, %v412_v18 }
 0x4c2   : > { %v533_v23 = vpack.c.bf16 %v532_v22, %v532_v22 }
 0x4c3   : > { %717 = vmatmul.mubr.msk.bf16.vlgmr.msra.gmra.mxu0 %vm119_vm1, %v413_v20 }
 0x4c4   : > { %727 = vmatpush3.bf16.msra.mxu0 %v540_v19  ;;  %728 = vmatprep.mubr.msk.bf16.mxu0 %vm782_vm0, %v781_v0 }
 0x4cb   : > { %729 = vmatmul.mubr.msk.bf16.vlgmr.msra.gmra.mxu0 %vm119_vm1, %v533_v23 }
 0x54e   : > { %v336_v24 = vpop.f32.mrf.mxu0 }
 0x54f   : > { %v665_v25 = vpack.c.bf16 %v336_v24, %v336_v24 }
 0x550   : > { %v706_v26 = vpop.f32.mrf.mxu0 }
 0x551   : > { %346 = vrot.lane.b32.xlu1 %v665_v25, %s794_s26 }
 0x552   : > { %v339_v27 = vpop.f32.mrf.mxu0 }
 0x554   : > { %v707_v28 = vpop.f32.mrf.mxu0 }
 0x583   : > { %v456_v29 = vpop.f32.mrf.mxu0 }
 0x584   : > { %v666_v30 = vpack.c.bf16 %v456_v29, %v456_v29 }
 0x585   : > { %v718_v31 = vpop.f32.mrf.mxu0 }
 0x586   : > { %466 = vrot.lane.b32.xlu0 %v666_v30, %s795_s27 }
 0x587   : > { %v459_v32 = vpop.f32.mrf.mxu0 }
 0x589   : > { %v719_v0 = vpop.f32.mrf.mxu0 }
 0x58b   : > { %v576_v33 = vpop.f32.mrf.mxu0 }
 0x58c   : > { %v667_v34 = vpack.c.bf16 %v576_v33, %v576_v33 }
 0x58d   : > { %v730_v35 = vpop.f32.mrf.mxu0 }
 0x58e   : > { %586 = vrot.lane.b32.xlu1 %v667_v34, %s796_s28 }
 0x58f   : > { %v579_v36 = vpop.f32.mrf.mxu0 }
 0x591   : > { %v731_v37 = vpop.f32.mrf.mxu0 }
 0x5c3   : > { %v347_v38 = vpop.permute.xlu1 %346 }
 0x5c4   : > { %350 = vst.msk [vmem:[%s868_s22] sm:$0xf] %vm349_vm4, %v347_v38 }
 0x5f8   : > { %v467_v39 = vpop.permute.xlu0 %466 }
 0x5f9   : > { %470 = vst.msk [vmem:[%s868_s22] sm:$0xf] %vm469_vm5, %v467_v39 }
 0x600   : > { %v587_v40 = vpop.permute.xlu1 %586 }
 0x601   : > { %590 = vst.msk [vmem:[%s868_s22] sm:$0xf] %vm589_vm6, %v587_v40 }
 0x602 PF: > { %s11_s6 = sadd.s32 1, %s779_s6  }
 0x603   : > { %p8_p4 = scmp.ge.s32.totalorder %s11_s6, 4  }
 0x605   :  { %10 = sbr.rel (!%p8_p4) target bundleno = 1 (0x1), region = 54 }

// kernel: block_forward.11
= control target key start
LH: loop header
LB: loop body
LE: loop exit
PB: predicated region body
PF: predicated region fallthrough
CT: control target
= control target key end

     0   :  { %vm18_vm0 = vcmask 261120   ;;  %vm70_vm1 = vcmask 257024   ;;  %s129_s0 = inlined_call_operand.vmem [shape: f32[16,32], index: 0, kind: input, shape index: {}]   ;;  %s130_s1 = inlined_call_operand.vmem [shape: f32[1,32], index: 1, kind: input, shape index: {}]   ;;  %s131_s2 = inlined_call_operand.vmem [shape: f32[1,32], index: 2, kind: input, shape index: {}]   ;;  %s132_s3 = inlined_call_operand.vmem [shape: bf16[16,32], index: 3, kind: output, shape index: {}]  }
   0x1   :  { %v14_v0 = vld [vmem:[%s129_s0] sm:$0xff]  ;;  %v15_v1 = vld [vmem:[%s129_s0 + $0x8] sm:$0xff] }
   0x2   :  { %v19_v2 = vsel %vm18_vm0, %v14_v0, 0.0  ;;  %v22_v3 = vsel %vm18_vm0, %v15_v1, 0.0  ;;  %v77_v21 = vld [vmem:[%s130_s1] ss:$0 sm:$0xff] }
   0x3   :  { %20 = vadd.xlane.f32.xlu0 %v19_v2  ;;  %v78_v23 = vld [vmem:[%s131_s2] ss:$0 sm:$0xff] }
   0x7   :  { %23 = vadd.xlane.f32.xlu0 %v22_v3 }
  0x8c   :  { %v21_v4 = vpop.xlane.xlu0 %20 }
  0x8d   :  { %v26_v5 = vmul.f32 0.03125, %v21_v4 }
  0x8f   :  { %v28_v6 = vsub.f32 %v14_v0, %v26_v5 }
  0x90   :  { %v24_v7 = vpop.xlane.xlu0 %23 }
  0x91   :  { %v27_v8 = vmul.f32 0.03125, %v24_v7  ;;  %v30_v9 = vmul.f32 %v28_v6, %v28_v6 }
  0x93   :  { %v29_v10 = vsub.f32 %v15_v1, %v27_v8  ;;  %v32_v11 = vsel %vm18_vm0, %v30_v9, 0.0 }
  0x94   :  { %33 = vadd.xlane.f32.xlu1 %v32_v11 }
  0x95   :  { %v31_v12 = vmul.f32 %v29_v10, %v29_v10 }
  0x97   :  { %v35_v13 = vsel %vm18_vm0, %v31_v12, 0.0 }
  0x98   :  { %36 = vadd.xlane.f32.xlu1 %v35_v13 }
 0x11d   :  { %v34_v14 = vpop.xlane.xlu1 %33 }
 0x11e   :  { %v38_v15 = vmul.f32 0.03125, %v34_v14 }
 0x120   :  { %v40_v16 = vadd.f32 1e-05, %v38_v15 }
 0x121   :  { %v37_v17 = vpop.xlane.xlu1 %36 }
 0x122   :  { %83 = vrsqrt.f32 %v40_v16  ;;  %v39_v18 = vmul.f32 0.03125, %v37_v17 }
 0x124   :  { %v41_v19 = vadd.f32 1e-05, %v39_v18 }
 0x126   :  { %85 = vrsqrt.f32 %v41_v19 }
 0x12f   :  { %v84_v20 = vpop.eup %83 }
 0x130   :  { %v44_v22 = vmul.f32 %v84_v20, %v28_v6 }
 0x132   :  { %v52_v24 = vmul.f32 %v77_v21, %v44_v22 }
 0x133   :  { %v86_v25 = vpop.eup %85 }
 0x134   :  { %v60_v26 = vadd.f32 %v78_v23, %v52_v24  ;;  %v45_v27 = vmul.f32 %v86_v25, %v29_v10 }
 0x136   :  { %v81_v28 = vpack.c.bf16 %v60_v26, %v60_v26  ;;  %v53_v29 = vmul.f32 %v77_v21, %v45_v27 }
 0x138   :  { %71 = vst.msk [vmem:[%s132_s3] sm:$0xf] %vm70_vm1, %v81_v28  ;;  %v61_v30 = vadd.f32 %v78_v23, %v53_v29 }
 0x13a   :  { %v82_v31 = vpack.c.bf16 %v61_v30, %v61_v30 }
 0x13c   :  { %72 = vst.msk [vmem:[%s132_s3 + $0x4] sm:$0xf] %vm70_vm1, %v82_v31 }

// kernel: block_forward.13
= control target key start
LH: loop header
LB: loop body
LE: loop exit
PB: predicated region body
PF: predicated region fallthrough
CT: control target
= control target key end

     0   :  { %v257_v1 = vmov 0.0   ;;  %vm258_vm0 = vmmov 0   ;;  %vm23_vm1 = vcmask 261120   ;;  %s332_s0 = inlined_call_operand.vmem [shape: bf16[16,128], index: 0, kind: input, shape index: {}]   ;;  %s333_s1 = inlined_call_operand.vmem [shape: bf16[128,32], index: 1, kind: input, shape index: {}]   ;;  %s334_s2 = inlined_call_operand.vmem [shape: f32[1,32], index: 2, kind: input, shape index: {}]   ;;  %s335_s3 = inlined_call_operand.vmem [shape: f32[16,32], index: 3, kind: input, shape index: {}]   ;;  %s336_s4 = inlined_call_operand.hbm [shape: f32[16,32], index: 4, kind: output, shape index: {}]  }
   0x1   :  { %v226_v0 = vld [vmem:[%s333_s1 + $0x38] sm:$0xff]   ;;  %201 = vmatprep.subr.bf16.mxu0 %v257_v1  ;;  %v227_v2 = vld [vmem:[%s333_s1 + $0x30] sm:$0xff]   ;;  %217 = vmatprep.mubr.msk.bf16.mxu0 %vm258_vm0, %v257_v1  ;;  %24 = vst.msk [vmem:[#allocation2] sm:$0xff] %vm23_vm1, %v257_v1  ;;  %25 = vst.msk [vmem:[#allocation2 + $0x8] sm:$0xff] %vm23_vm1, %v257_v1 }
   0x2   :  { %202 = vmatpush3.bf16.msra.mxu0 %v226_v0  ;;  %v228_v3 = vld [vmem:[%s333_s1 + $0x28] sm:$0xff]  }
   0x3   :  { %203 = vmatprep.subr.bf16.mxu0 %v257_v1 }
   0x6   :  { %204 = vmatpush3.bf16.msra.mxu0 %v227_v2 }
   0x7   :  { %205 = vmatprep.subr.bf16.mxu0 %v257_v1 }
   0x8   :  { %9 = vsyncpa [#allocation4], 0  ;;  %v229_v4 = vld [vmem:[%s333_s1 + $0x20] sm:$0xff]   ;;  %v230_v5 = vld [vmem:[%s333_s1 + $0x18] sm:$0xff]   ;;  %s259_s9 = smov [#allocation3]  }
   0x9   :  { %v231_v6 = vld [vmem:[%s333_s1 + $0x10] sm:$0xff]   ;;  %v232_v7 = vld [vmem:[%s333_s1 + $0x8] sm:$0xff]   ;;  %v233_v8 = vld [vmem:[%s333_s1] sm:$0xff]   ;;  %s171_s10 = sshll.u32 %s259_s9, 4  ;;  %s172_s10 = int_to_ptr.vmem [resolvable:$true] %s171_s10 }
   0xa   :  { %206 = vmatpush3.bf16.msra.mxu0 %v228_v3  ;;  %v234_v9 = vld [vmem:[%s332_s0] sm:$0xff]   ;;  %v27_v14 = vld [vmem:[#allocation2 + $0x8] sm:$0xff]  ;;  %p240_p1 = scmp.lt.s32.totalorder %s172_s10, %s172_s10 }
   0xb   :  { %207 = vmatprep.subr.bf16.mxu0 %v257_v1  ;;  %v26_v10 = vld [vmem:[#allocation2] sm:$0xff]  ;;  %v161_v24 = vld [vmem:[%s335_s3 + $0x8] sm:$0xff] }
   0xc   :  { %v191_v18 = vld [vmem:[%s334_s2] ss:$0 sm:$0xff]  ;;  %s235_s2 = scalar_lea.vmem %s172_s10, 256 }
   0xd   :  { %v160_v20 = vld [vmem:[%s335_s3] sm:$0xff]  ;;  %p236_p0 = scmp.ne.s32.totalorder %s172_s10, %s235_s2  ;;  %p241_p2 = scmp.lt.s32.totalorder %s235_s2, %s235_s2 }
   0xe   :  { %208 = vmatpush3.bf16.msra.mxu0 %v229_v4 }
   0xf   :  { %209 = vmatprep.subr.bf16.mxu0 %v257_v1  ;;  %p242_p3 = por %p241_p2, %p240_p1 }
  0x11   :  { %p243_p4 = pnand %p242_p3, %p236_p0 }
  0x12   :  { %210 = vmatpush3.bf16.msra.mxu0 %v230_v5 }
  0x13   :  { %211 = vmatprep.subr.bf16.mxu0 %v257_v1 }
  0x16   :  { %212 = vmatpush3.bf16.msra.mxu0 %v231_v6 }
  0x17   :  { %213 = vmatprep.subr.bf16.mxu0 %v257_v1 }
  0x1a   :  { %214 = vmatpush3.bf16.msra.mxu0 %v232_v7 }
  0x1b   :  { %215 = vmatprep.subr.bf16.mxu0 %v257_v1 }
  0x1e   :  { %216 = vmatpush3.bf16.msra.mxu0 %v233_v8 }
  0x21   :  { %218 = vmatmul.mubr.bf16.vlgmr.msra.gmra.mxu0 %v234_v9 }
  0xe1   :  { %v134_v11 = vpop.f32.mrf.mxu0 }
  0xe2   :  { %v141_v12 = vadd.f32 %v134_v11, %v26_v10 }
  0xe3   :  { %v219_v13 = vpop.f32.mrf.mxu0 }
  0xe4   :  { %144 = vst.msk [vmem:[#allocation2] sm:$0xff] %vm23_vm1, %v141_v12 }
  0xe5   :  { %v137_v15 = vpop.f32.mrf.mxu0 }
  0xe6   :  { %v142_v16 = vadd.f32 %v137_v15, %v27_v14 }
  0xe7   :  { %v220_v17 = vpop.f32.mrf.mxu0 }
  0xe8   :  { %145 = vst.msk [vmem:[#allocation2 + $0x8] sm:$0xff] %vm23_vm1, %v142_v16 }
  0xeb   :  { %v149_v19 = vld [vmem:[#allocation2] sm:$0xff] }
  0xec   :  { %v158_v21 = vadd.f32 %v191_v18, %v149_v19 }
  0xee   :  { %v162_v22 = vadd.f32 %v160_v20, %v158_v21 }
  0xef   :  { %v150_v23 = vld [vmem:[#allocation2 + $0x8] sm:$0xff] }
  0xf0   :  { %v159_v25 = vadd.f32 %v191_v18, %v150_v23  ;;  %164 = vst.msk [vmem:[#allocation3] sm:$0xff] %vm23_vm1, %v162_v22 }
  0xf2   :  { %v163_v26 = vadd.f32 %v161_v24, %v159_v25 }
  0xf4   :  { %165 = vst.msk [vmem:[#allocation3 + $0x8] sm:$0xff] %vm23_vm1, %v163_v26 }
  0xf5   :  { %246 = shalt.err (!%p243_p4)
}
  0xf6   :  { %s260_s13 = smov 128   ;;  %s261_s14 = smov 8  }
  0xf7   :  { %177 = dma.vmem_to_hbm [thread:$0]  %s172_s10, 256, %s336_s4, [#allocation4], %s260_s13, %s260_s13, %s261_s14  }
  0xf8   :  { %255 = dma.done.wait [#allocation4], 256  }
  0xf9   :  { %256 = vsyncadd [#allocation4], 4294967040 }
  0xfa   :  { %181 = vsyncpa [#allocation4], 1 }

// kernel: block_forward.12
= control target key start
LH: loop header
LB: loop body
LE: loop exit
PB: predicated region body
PF: predicated region fallthrough
CT: control target
= control target key end

     0   :  { %v215_v0 = vmov 0.0   ;;  %vm216_vm0 = vmmov 0   ;;  %vm46_vm1 = vcmask 261120   ;;  %s252_s1 = inlined_call_operand.vmem [shape: bf16[32,128], index: 1, kind: input, shape index: {}]   ;;  %s253_s0 = inlined_call_operand.vmem [shape: bf16[16,32], index: 0, kind: input, shape index: {}]   ;;  %s254_s2 = inlined_call_operand.vmem [shape: f32[1,128], index: 2, kind: input, shape index: {}]   ;;  %s255_s3 = inlined_call_operand.vmem [shape: bf16[16,128], index: 3, kind: output, shape index: {}]  }
   0x1   :  { %194 = vmatprep.subr.bf16.mxu0 %v215_v0  ;;  %v204_v1 = vld [vmem:[%s252_s1 + $0x8] sm:$0xff]   ;;  %198 = vmatprep.mubr.msk.bf16.mxu0 %vm216_vm0, %v215_v0  ;;  %v205_v2 = vld [vmem:[%s252_s1] sm:$0xff]  }
   0x2   :  { %195 = vmatpush3.bf16.msra.mxu0 %v204_v1  ;;  %v206_v3 = vld [vmem:[%s253_s0] sm:$0xff]  }
   0x3   :  { %196 = vmatprep.subr.bf16.mxu0 %v215_v0  ;;  %v181_v4 = vld [vmem:[%s254_s2] ss:$0 sm:$0xff] }
   0x6   :  { %197 = vmatpush3.bf16.msra.mxu0 %v205_v2 }
   0x9   :  { %199 = vmatmul.mubr.msk.bf16.vlgmr.msra.gmra.mxu0 %vm46_vm1, %v206_v3 }
  0xc9   :  { %v84_v5 = vpop.f32.mrf.mxu0 }
  0xca   :  { %v107_v6 = vadd.f32 %v181_v4, %v84_v5 }
  0xcb   :  { %v200_v7 = vpop.f32.mrf.mxu0 }
  0xcc   :  { %v111_v8 = vmul.f32 0.70710677, %v107_v6  ;;  %v109_v56 = vmul.f32 0.5, %v107_v6 }
  0xcd   :  { %v87_v9 = vpop.f32.mrf.mxu0 }
  0xce   :  { %v113_v10 = vand.u32 2147483647, %v111_v8  ;;  %v108_v11 = vadd.f32 %v181_v4, %v87_v9  ;;  %vm153_vm2 = vcmp.lt.f32.partialorder %v111_v8, 0.0 }
  0xcf   :  { %v201_v12 = vpop.f32.mrf.mxu0 }
  0xd0   :  { %v115_v13 = vmul.f32 0.3275911, %v113_v10  ;;  %v112_v14 = vmul.f32 0.70710677, %v108_v11  ;;  %v141_v19 = vsub.f32 0.0, %v113_v10  ;;  %v110_v57 = vmul.f32 0.5, %v108_v11 }
  0xd2   :  { %v117_v15 = vadd.f32 1.0, %v115_v13  ;;  %v114_v16 = vand.u32 2147483647, %v112_v14  ;;  %v143_v20 = vmul.f32 %v141_v19, %v113_v10  ;;  %vm154_vm3 = vcmp.lt.f32.partialorder %v112_v14, 0.0 }
  0xd4   :  { %207 = vrcp.f32 %v117_v15  ;;  %v116_v17 = vmul.f32 0.3275911, %v114_v16  ;;  %v142_v21 = vsub.f32 0.0, %v114_v16  ;;  %v145_v24 = vmul.f32 1.442695, %v143_v20 }
  0xd6   :  { %v118_v18 = vadd.f32 1.0, %v116_v17  ;;  %v144_v25 = vmul.f32 %v142_v21, %v114_v16 }
  0xd8   :  { %209 = vrcp.f32 %v118_v18  ;;  %v147_v30 = vmul.f32 1.442695, %v144_v25 }
  0xd9   :  { %211 = vpow2.f32 %v145_v24 }
  0xda   :  { %213 = vpow2.f32 %v147_v30 }
  0xe1   :  { %v208_v22 = vpop.eup %207 }
  0xe2   :  { %v123_v23 = vmul.f32 1.0614054, %v208_v22 }
  0xe4   :  { %v125_v26 = vadd.f32 -1.4531521, %v123_v23 }
  0xe5   :  { %v210_v27 = vpop.eup %209 }
  0xe6   :  { %v127_v28 = vmul.f32 %v208_v22, %v125_v26  ;;  %v124_v29 = vmul.f32 1.0614054, %v210_v27  ;;  %v212_v43 = vpop.eup %211 }
  0xe7   :  { %v214_v48 = vpop.eup %213 }
  0xe8   :  { %v129_v31 = vadd.f32 1.4214138, %v127_v28  ;;  %v126_v32 = vadd.f32 -1.4531521, %v124_v29 }
  0xea   :  { %v131_v33 = vmul.f32 %v208_v22, %v129_v31  ;;  %v128_v34 = vmul.f32 %v210_v27, %v126_v32 }
  0xec   :  { %v133_v35 = vadd.f32 -0.28449672, %v131_v33  ;;  %v130_v36 = vadd.f32 1.4214138, %v128_v34 }
  0xee   :  { %v135_v37 = vmul.f32 %v208_v22, %v133_v35  ;;  %v132_v38 = vmul.f32 %v210_v27, %v130_v36 }
  0xf0   :  { %v137_v39 = vadd.f32 0.2548296, %v135_v37  ;;  %v134_v40 = vadd.f32 -0.28449672, %v132_v38 }
  0xf2   :  { %v139_v41 = vmul.f32 %v208_v22, %v137_v39  ;;  %v136_v42 = vmul.f32 %v210_v27, %v134_v40 }
  0xf4   :  { %v149_v44 = vmul.f32 %v212_v43, %v139_v41  ;;  %v138_v45 = vadd.f32 0.2548296, %v136_v42 }
  0xf6   :  { %v151_v46 = vsub.f32 1.0, %v149_v44  ;;  %v140_v47 = vmul.f32 %v210_v27, %v138_v45 }
  0xf8   :  { %v155_v49 = vsub.f32 0.0, %v151_v46  ;;  %v150_v50 = vmul.f32 %v214_v48, %v140_v47 }
  0xfa   :  { %v157_v51 = vsel %vm153_vm2, %v155_v49, %v151_v46  ;;  %v152_v52 = vsub.f32 1.0, %v150_v50 }
  0xfb   :  { %v159_v54 = vadd.f32 1.0, %v157_v51 }
  0xfc   :  { %v156_v53 = vsub.f32 0.0, %v152_v52 }
  0xfd   :  { %v161_v59 = vmul.f32 %v159_v54, %v109_v56 }
  0xfe   :  { %v158_v55 = vsel %vm154_vm3, %v156_v53, %v152_v52 }
  0xff   :  { %v160_v58 = vadd.f32 1.0, %v158_v55 }
 0x101   :  { %v162_v60 = vmul.f32 %v160_v58, %v110_v57 }
 0x103   :  { %v189_v61 = vpack.c.bf16 %v162_v60, %v161_v59 }
 0x105   :  { %190 = vst [vmem:[%s255_s3] sm:$0xff] %v189_v61  }

</bundles_post_ra>
